<compile_context>
chip_gen: v7x
topology: tpu7x:2x2x1
jax: 0.10.0
libtpu: 0.0.40
codegen_flags: <defaults>
</compile_context>

<pallas_src>
import math

import jax
import jax.numpy as jnp
import numpy as np
from jax.experimental import pallas as pl
from jax.experimental.pallas import tpu as pltpu


# ----------------------------------------------------------------------------
# Pallas kernel: pose-matrix transform, per sample n (whole B/C/P block).
#   out[b, c, i, k, f] = sum_j pose[b, i, j, f] * wb[b, c, j, k, f]
# with f the flattened (Fo, Fo, K, K) lane axis.
# ----------------------------------------------------------------------------
def _conv_caps_kernel(pose_ref, wb_ref, out_ref):
    # pose_ref: [B, Pi, Pj, L]
    # wb_ref:   [B, C, Pj, Pk, L]   (resident across the grid)
    # out_ref:  [B, C, Pi, Pk, L]
    Bb, Cc, Pj, Pk, L = wb_ref.shape

    # Loop over b keeps the live working set small (~40 vregs) -> no spills.
    for b in range(Bb):
        pose_b = pose_ref[b]            # [Pi, Pj, L]
        wb_b = wb_ref[b]                # [C, Pj, Pk, L]

        # Unrolled contraction over the (tiny, static) P_j axis; each term is a
        # lane-dense [C, Pi, Pk, L] VPU multiply-add.
        acc = pose_b[None, :, 0, None, :] * wb_b[:, None, 0, :, :]
        for j in range(1, Pj):
            acc = acc + pose_b[None, :, j, None, :] * wb_b[:, None, j, :, :]

        out_ref[b] = acc.astype(out_ref.dtype)


def _conv_caps_pallas(pose_k, wb):
    # pose_k: [N, B, P, P, L]    wb: [B, C, P, P, L]
    N, B, P, _, L = pose_k.shape
    C = wb.shape[1]

    return pl.pallas_call(
        _conv_caps_kernel,
        out_shape=jax.ShapeDtypeStruct((N, B, C, P, P, L), jnp.float32),
        grid=(N,),
        in_specs=[
            # per-sample pose block; leading N dim squeezed out of the kernel ref
            pl.BlockSpec((None, B, P, P, L), lambda n: (n, 0, 0, 0, 0)),
            # constant block index -> weights stay resident in VMEM (1 DMA total)
            pl.BlockSpec((B, C, P, P, L), lambda n: (0, 0, 0, 0, 0)),
        ],
        out_specs=pl.BlockSpec((None, B, C, P, P, L),
                               lambda n: (n, 0, 0, 0, 0, 0)),
        compiler_params=pltpu.CompilerParams(
            dimension_semantics=("parallel",)),
    )(pose_k, wb)


# ----------------------------------------------------------------------------
# Glue: torch-style unfold over the last two (H, W) dims, done in plain JAX
# ----------------------------------------------------------------------------
def _unfold_hw(x, K, S):
    """x: [..., H, W] -> [..., Fo_h, Fo_w, K, K] (matches torch .unfold twice)."""
    H, W = x.shape[-2], x.shape[-1]
    Fh = (H - K) // S + 1
    Fw = (W - K) // S + 1
    ih = (jnp.arange(Fh) * S)[:, None] + jnp.arange(K)[None, :]   # [Fh, K]
    iw = (jnp.arange(Fw) * S)[:, None] + jnp.arange(K)[None, :]   # [Fw, K]
    # advanced indexing -> [..., Fh, K, Fw, K]
    out = x[..., ih[:, :, None, None], iw[None, None, :, :]]
    nd = out.ndim
    perm = tuple(range(nd - 4)) + (nd - 4, nd - 2, nd - 3, nd - 1)
    return jnp.transpose(out, perm)                               # [..., Fh, Fw, K, K]


# ----------------------------------------------------------------------------
# Forward wrapper (mirrors ConvCapsules2D.forward, default config)
# ----------------------------------------------------------------------------
def conv_capsules2d_forward(activations, poses, W_ij, K, S):
    """
    activations: [N, B, H, W]
    poses:       [N, B, P, P, H, W]
    W_ij:        [1, B, C, 1, P, P, 1, 1, K, K]
    returns (activations_out, V_ji) exactly as the PyTorch module does.
    """
    N, B, P, _, H, W = poses.shape
    C = W_ij.shape[2]
    Fo = (H - K) // S + 1
    L = Fo * Fo * K * K

    # --- unfold (gather glue) ---
    poses_u = _unfold_hw(poses, K, S)                  # [N,B,P,P,Fo,Fo,K,K]
    acts_u = _unfold_hw(activations, K, S)             # [N,B,Fo,Fo,K,K]
    acts_out = acts_u.reshape(N, B, 1, 1, 1, Fo, Fo, K, K)

    # --- kernel inputs: contiguous reshapes only (no transposes) ---
    pose_k = poses_u.reshape(N, B, P, P, L)            # lane order (fh,fw,kh,kw)

    # pre-broadcast W over the Fo*Fo output positions (tiny tensor, DMA'd once)
    w = W_ij.astype(jnp.float32).reshape(B, C, P, P, K, K)
    wb = jnp.broadcast_to(w[:, :, :, :, None, :, :],
                          (B, C, P, P, Fo * Fo, K, K)).reshape(B, C, P, P, L)

    # --- hot path in Pallas ---
    V = _conv_caps_pallas(pose_k.astype(jnp.float32), wb)   # [N,B,C,P,P,L]

    # --- contiguous reshape straight into the PyTorch output layout ---
    V_ji = V.reshape(N, B, C, P * P, 1, Fo, Fo, K, K)
    return acts_out, V_ji


def init_W_ij(key, B, C, P, K):
    """xavier_uniform init, same fan computation as the PyTorch module."""
    PP = max(2, P * P)
    fan_in = B * K * K * PP
    fan_out = C * K * K * PP
    std = math.sqrt(2.0 / (fan_in + fan_out))
    bound = math.sqrt(3.0) * std
    return jax.random.uniform(key, (1, B, C, 1, P, P, 1, 1, K, K),
                              dtype=jnp.float32, minval=-bound, maxval=bound)


if __name__ == "__main__":
    # Small shapes: batch N=2, in_caps B=4, out_caps C=4, pose_dim P=4,
    # kernel K=3, stride S=2, spatial 8x8  -> Fo = 3, L = 81
    N, B, C, P, K, S, H = 2, 4, 4, 4, 3, 2, 8

    key = jax.random.PRNGKey(0)
    k1, k2, k3 = jax.random.split(key, 3)
    activations = jax.random.uniform(k1, (N, B, H, H), dtype=jnp.float32)
    poses = jax.random.normal(k2, (N, B, P, P, H, H), dtype=jnp.float32)
    W_ij = init_W_ij(k3, B, C, P, K)

    acts_out, V_ji = conv_capsules2d_forward(activations, poses, W_ij, K, S)
    acts_out = jax.block_until_ready(acts_out)
    V_ji = jax.block_until_ready(V_ji)

    # --- pure-JAX reference mirroring the PyTorch broadcast semantics ---
    Fo = (H - K) // S + 1
    poses_u = _unfold_hw(poses, K, S)                            # [N,B,P,P,Fo,Fo,K,K]
    poses_e = poses_u[:, :, None, :, :, None, :, :, :, :]        # [N,B,1,P,P,1,Fo,Fo,K,K]
    V_ref = (poses_e * W_ij).sum(axis=4)                         # [N,B,C,P,P,Fo,Fo,K,K]
    V_ref = V_ref.reshape(N, B, C, P * P, 1, Fo, Fo, K, K)
    acts_ref = _unfold_hw(activations, K, S).reshape(N, B, 1, 1, 1, Fo, Fo, K, K)

    assert V_ji.shape == (N, B, C, P * P, 1, Fo, Fo, K, K), V_ji.shape
    assert acts_out.shape == (N, B, 1, 1, 1, Fo, Fo, K, K), acts_out.shape
    np.testing.assert_allclose(np.asarray(V_ji), np.asarray(V_ref),
                               rtol=1e-5, atol=1e-5)
    np.testing.assert_allclose(np.asarray(acts_out), np.asarray(acts_ref),
                               rtol=1e-6, atol=1e-6)

    print("KERNEL_OK")
</pallas_src>

<mosaic_0001>
module attributes {stable_mosaic.version = 11 : i64} {
  func.func @_conv_caps_kernel(%arg0: i32, %arg1: memref<1x4x4x4x81xf32, #tpu.memory_space<vmem>>, %arg2: memref<4x4x4x4x81xf32, #tpu.memory_space<vmem>>, %arg3: memref<1x4x4x4x4x81xf32, #tpu.memory_space<vmem>>) attributes {dimension_semantics = [#tpu.dimension_semantics<parallel>], iteration_bounds = array<i64: 2>, scalar_prefetch = 0 : i64, scratch_operands = 0 : i64, tpu.core_type = #tpu.core_type<tc>, window_params = [{transform_indices = @transform_0, window_bounds = array<i64: 1, 4, 4, 4, 81>}, {pipeline_mode = #tpu.pipeline_mode<synchronous>, transform_indices = @transform_1, window_bounds = array<i64: 4, 4, 4, 4, 81>}, {transform_indices = @transform_2, window_bounds = array<i64: 1, 4, 4, 4, 4, 81>}]} {
    %c0 = arith.constant 0 : index
    %c0_0 = arith.constant 0 : index
    %c0_1 = arith.constant 0 : index
    %c0_2 = arith.constant 0 : index
    %c0_3 = arith.constant 0 : index
    %0 = vector.load %arg1[%c0, %c0_0, %c0_1, %c0_2, %c0_3] : memref<1x4x4x4x81xf32, #tpu.memory_space<vmem>>, vector<1x1x4x4x81xf32>
    %1 = vector.shape_cast %0 : vector<1x1x4x4x81xf32> to vector<4x4x81xf32>
    %c0_4 = arith.constant 0 : index
    %c0_5 = arith.constant 0 : index
    %c0_6 = arith.constant 0 : index
    %c0_7 = arith.constant 0 : index
    %c0_8 = arith.constant 0 : index
    %2 = vector.load %arg2[%c0_4, %c0_5, %c0_6, %c0_7, %c0_8] : memref<4x4x4x4x81xf32, #tpu.memory_space<vmem>>, vector<1x4x4x4x81xf32>
    %3 = vector.shape_cast %2 : vector<1x4x4x4x81xf32> to vector<4x4x4x81xf32>
    %4 = vector.extract_strided_slice %1 {offsets = [0, 0, 0], sizes = [4, 1, 81], strides = [1, 1, 1]} : vector<4x4x81xf32> to vector<4x1x81xf32>
    %5 = vector.shape_cast %4 : vector<4x1x81xf32> to vector<4x81xf32>
    %6 = vector.shape_cast %5 : vector<4x81xf32> to vector<1x4x1x81xf32>
    %7 = vector.extract_strided_slice %3 {offsets = [0, 0, 0, 0], sizes = [4, 1, 4, 81], strides = [1, 1, 1, 1]} : vector<4x4x4x81xf32> to vector<4x1x4x81xf32>
    %8 = vector.shape_cast %7 : vector<4x1x4x81xf32> to vector<4x4x81xf32>
    %9 = vector.shape_cast %8 : vector<4x4x81xf32> to vector<4x1x4x81xf32>
    %10 = vector.broadcast %6 : vector<1x4x1x81xf32> to vector<4x4x4x81xf32>
    %11 = vector.broadcast %9 : vector<4x1x4x81xf32> to vector<4x4x4x81xf32>
    %12 = arith.mulf %10, %11 : vector<4x4x4x81xf32>
    %13 = vector.extract_strided_slice %1 {offsets = [0, 1, 0], sizes = [4, 1, 81], strides = [1, 1, 1]} : vector<4x4x81xf32> to vector<4x1x81xf32>
    %14 = vector.shape_cast %13 : vector<4x1x81xf32> to vector<4x81xf32>
    %15 = vector.shape_cast %14 : vector<4x81xf32> to vector<1x4x1x81xf32>
    %16 = vector.extract_strided_slice %3 {offsets = [0, 1, 0, 0], sizes = [4, 1, 4, 81], strides = [1, 1, 1, 1]} : vector<4x4x4x81xf32> to vector<4x1x4x81xf32>
    %17 = vector.shape_cast %16 : vector<4x1x4x81xf32> to vector<4x4x81xf32>
    %18 = vector.shape_cast %17 : vector<4x4x81xf32> to vector<4x1x4x81xf32>
    %19 = vector.broadcast %15 : vector<1x4x1x81xf32> to vector<4x4x4x81xf32>
    %20 = vector.broadcast %18 : vector<4x1x4x81xf32> to vector<4x4x4x81xf32>
    %21 = arith.mulf %19, %20 : vector<4x4x4x81xf32>
    %22 = arith.addf %12, %21 : vector<4x4x4x81xf32>
    %23 = vector.extract_strided_slice %1 {offsets = [0, 2, 0], sizes = [4, 1, 81], strides = [1, 1, 1]} : vector<4x4x81xf32> to vector<4x1x81xf32>
    %24 = vector.shape_cast %23 : vector<4x1x81xf32> to vector<4x81xf32>
    %25 = vector.shape_cast %24 : vector<4x81xf32> to vector<1x4x1x81xf32>
    %26 = vector.extract_strided_slice %3 {offsets = [0, 2, 0, 0], sizes = [4, 1, 4, 81], strides = [1, 1, 1, 1]} : vector<4x4x4x81xf32> to vector<4x1x4x81xf32>
    %27 = vector.shape_cast %26 : vector<4x1x4x81xf32> to vector<4x4x81xf32>
    %28 = vector.shape_cast %27 : vector<4x4x81xf32> to vector<4x1x4x81xf32>
    %29 = vector.broadcast %25 : vector<1x4x1x81xf32> to vector<4x4x4x81xf32>
    %30 = vector.broadcast %28 : vector<4x1x4x81xf32> to vector<4x4x4x81xf32>
    %31 = arith.mulf %29, %30 : vector<4x4x4x81xf32>
    %32 = arith.addf %22, %31 : vector<4x4x4x81xf32>
    %33 = vector.extract_strided_slice %1 {offsets = [0, 3, 0], sizes = [4, 1, 81], strides = [1, 1, 1]} : vector<4x4x81xf32> to vector<4x1x81xf32>
    %34 = vector.shape_cast %33 : vector<4x1x81xf32> to vector<4x81xf32>
    %35 = vector.shape_cast %34 : vector<4x81xf32> to vector<1x4x1x81xf32>
    %36 = vector.extract_strided_slice %3 {offsets = [0, 3, 0, 0], sizes = [4, 1, 4, 81], strides = [1, 1, 1, 1]} : vector<4x4x4x81xf32> to vector<4x1x4x81xf32>
    %37 = vector.shape_cast %36 : vector<4x1x4x81xf32> to vector<4x4x81xf32>
    %38 = vector.shape_cast %37 : vector<4x4x81xf32> to vector<4x1x4x81xf32>
    %39 = vector.broadcast %35 : vector<1x4x1x81xf32> to vector<4x4x4x81xf32>
    %40 = vector.broadcast %38 : vector<4x1x4x81xf32> to vector<4x4x4x81xf32>
    %41 = arith.mulf %39, %40 : vector<4x4x4x81xf32>
    %42 = arith.addf %32, %41 : vector<4x4x4x81xf32>
    %c0_9 = arith.constant 0 : index
    %c0_10 = arith.constant 0 : index
    %c0_11 = arith.constant 0 : index
    %c0_12 = arith.constant 0 : index
    %c0_13 = arith.constant 0 : index
    %c0_14 = arith.constant 0 : index
    %43 = vector.load %arg3[%c0_9, %c0_10, %c0_11, %c0_12, %c0_13, %c0_14] : memref<1x4x4x4x4x81xf32, #tpu.memory_space<vmem>>, vector<1x1x4x4x4x81xf32>
    %44 = vector.shape_cast %43 : vector<1x1x4x4x4x81xf32> to vector<4x4x4x81xf32>
    %45 = vector.shape_cast %42 : vector<4x4x4x81xf32> to vector<1x1x4x4x4x81xf32>
    tpu.vector_store %arg3[%c0_9, %c0_10, %c0_11, %c0_12, %c0_13, %c0_14], %45 {strides = array<i32>} : memref<1x4x4x4x4x81xf32, #tpu.memory_space<vmem>>, vector<1x1x4x4x4x81xf32>,
    %c0_15 = arith.constant 0 : index
    %c1 = arith.constant 1 : index
    %c0_16 = arith.constant 0 : index
    %c0_17 = arith.constant 0 : index
    %c0_18 = arith.constant 0 : index
    %46 = vector.load %arg1[%c0_15, %c1, %c0_16, %c0_17, %c0_18] : memref<1x4x4x4x81xf32, #tpu.memory_space<vmem>>, vector<1x1x4x4x81xf32>
    %47 = vector.shape_cast %46 : vector<1x1x4x4x81xf32> to vector<4x4x81xf32>
    %c1_19 = arith.constant 1 : index
    %c0_20 = arith.constant 0 : index
    %c0_21 = arith.constant 0 : index
    %c0_22 = arith.constant 0 : index
    %c0_23 = arith.constant 0 : index
    %48 = vector.load %arg2[%c1_19, %c0_20, %c0_21, %c0_22, %c0_23] : memref<4x4x4x4x81xf32, #tpu.memory_space<vmem>>, vector<1x4x4x4x81xf32>
    %49 = vector.shape_cast %48 : vector<1x4x4x4x81xf32> to vector<4x4x4x81xf32>
    %50 = vector.extract_strided_slice %47 {offsets = [0, 0, 0], sizes = [4, 1, 81], strides = [1, 1, 1]} : vector<4x4x81xf32> to vector<4x1x81xf32>
    %51 = vector.shape_cast %50 : vector<4x1x81xf32> to vector<4x81xf32>
    %52 = vector.shape_cast %51 : vector<4x81xf32> to vector<1x4x1x81xf32>
    %53 = vector.extract_strided_slice %49 {offsets = [0, 0, 0, 0], sizes = [4, 1, 4, 81], strides = [1, 1, 1, 1]} : vector<4x4x4x81xf32> to vector<4x1x4x81xf32>
    %54 = vector.shape_cast %53 : vector<4x1x4x81xf32> to vector<4x4x81xf32>
    %55 = vector.shape_cast %54 : vector<4x4x81xf32> to vector<4x1x4x81xf32>
    %56 = vector.broadcast %52 : vector<1x4x1x81xf32> to vector<4x4x4x81xf32>
    %57 = vector.broadcast %55 : vector<4x1x4x81xf32> to vector<4x4x4x81xf32>
    %58 = arith.mulf %56, %57 : vector<4x4x4x81xf32>
    %59 = vector.extract_strided_slice %47 {offsets = [0, 1, 0], sizes = [4, 1, 81], strides = [1, 1, 1]} : vector<4x4x81xf32> to vector<4x1x81xf32>
    %60 = vector.shape_cast %59 : vector<4x1x81xf32> to vector<4x81xf32>
    %61 = vector.shape_cast %60 : vector<4x81xf32> to vector<1x4x1x81xf32>
    %62 = vector.extract_strided_slice %49 {offsets = [0, 1, 0, 0], sizes = [4, 1, 4, 81], strides = [1, 1, 1, 1]} : vector<4x4x4x81xf32> to vector<4x1x4x81xf32>
    %63 = vector.shape_cast %62 : vector<4x1x4x81xf32> to vector<4x4x81xf32>
    %64 = vector.shape_cast %63 : vector<4x4x81xf32> to vector<4x1x4x81xf32>
    %65 = vector.broadcast %61 : vector<1x4x1x81xf32> to vector<4x4x4x81xf32>
    %66 = vector.broadcast %64 : vector<4x1x4x81xf32> to vector<4x4x4x81xf32>
    %67 = arith.mulf %65, %66 : vector<4x4x4x81xf32>
    %68 = arith.addf %58, %67 : vector<4x4x4x81xf32>
    %69 = vector.extract_strided_slice %47 {offsets = [0, 2, 0], sizes = [4, 1, 81], strides = [1, 1, 1]} : vector<4x4x81xf32> to vector<4x1x81xf32>
    %70 = vector.shape_cast %69 : vector<4x1x81xf32> to vector<4x81xf32>
    %71 = vector.shape_cast %70 : vector<4x81xf32> to vector<1x4x1x81xf32>
    %72 = vector.extract_strided_slice %49 {offsets = [0, 2, 0, 0], sizes = [4, 1, 4, 81], strides = [1, 1, 1, 1]} : vector<4x4x4x81xf32> to vector<4x1x4x81xf32>
    %73 = vector.shape_cast %72 : vector<4x1x4x81xf32> to vector<4x4x81xf32>
    %74 = vector.shape_cast %73 : vector<4x4x81xf32> to vector<4x1x4x81xf32>
    %75 = vector.broadcast %71 : vector<1x4x1x81xf32> to vector<4x4x4x81xf32>
    %76 = vector.broadcast %74 : vector<4x1x4x81xf32> to vector<4x4x4x81xf32>
    %77 = arith.mulf %75, %76 : vector<4x4x4x81xf32>
    %78 = arith.addf %68, %77 : vector<4x4x4x81xf32>
    %79 = vector.extract_strided_slice %47 {offsets = [0, 3, 0], sizes = [4, 1, 81], strides = [1, 1, 1]} : vector<4x4x81xf32> to vector<4x1x81xf32>
    %80 = vector.shape_cast %79 : vector<4x1x81xf32> to vector<4x81xf32>
    %81 = vector.shape_cast %80 : vector<4x81xf32> to vector<1x4x1x81xf32>
    %82 = vector.extract_strided_slice %49 {offsets = [0, 3, 0, 0], sizes = [4, 1, 4, 81], strides = [1, 1, 1, 1]} : vector<4x4x4x81xf32> to vector<4x1x4x81xf32>
    %83 = vector.shape_cast %82 : vector<4x1x4x81xf32> to vector<4x4x81xf32>
    %84 = vector.shape_cast %83 : vector<4x4x81xf32> to vector<4x1x4x81xf32>
    %85 = vector.broadcast %81 : vector<1x4x1x81xf32> to vector<4x4x4x81xf32>
    %86 = vector.broadcast %84 : vector<4x1x4x81xf32> to vector<4x4x4x81xf32>
    %87 = arith.mulf %85, %86 : vector<4x4x4x81xf32>
    %88 = arith.addf %78, %87 : vector<4x4x4x81xf32>
    %c0_24 = arith.constant 0 : index
    %c1_25 = arith.constant 1 : index
    %c0_26 = arith.constant 0 : index
    %c0_27 = arith.constant 0 : index
    %c0_28 = arith.constant 0 : index
    %c0_29 = arith.constant 0 : index
    %89 = vector.load %arg3[%c0_24, %c1_25, %c0_26, %c0_27, %c0_28, %c0_29] : memref<1x4x4x4x4x81xf32, #tpu.memory_space<vmem>>, vector<1x1x4x4x4x81xf32>
    %90 = vector.shape_cast %89 : vector<1x1x4x4x4x81xf32> to vector<4x4x4x81xf32>
    %91 = vector.shape_cast %88 : vector<4x4x4x81xf32> to vector<1x1x4x4x4x81xf32>
    tpu.vector_store %arg3[%c0_24, %c1_25, %c0_26, %c0_27, %c0_28, %c0_29], %91 {strides = array<i32>} : memref<1x4x4x4x4x81xf32, #tpu.memory_space<vmem>>, vector<1x1x4x4x4x81xf32>,
    %c0_30 = arith.constant 0 : index
    %c2 = arith.constant 2 : index
    %c0_31 = arith.constant 0 : index
    %c0_32 = arith.constant 0 : index
    %c0_33 = arith.constant 0 : index
    %92 = vector.load %arg1[%c0_30, %c2, %c0_31, %c0_32, %c0_33] : memref<1x4x4x4x81xf32, #tpu.memory_space<vmem>>, vector<1x1x4x4x81xf32>
    %93 = vector.shape_cast %92 : vector<1x1x4x4x81xf32> to vector<4x4x81xf32>
    %c2_34 = arith.constant 2 : index
    %c0_35 = arith.constant 0 : index
    %c0_36 = arith.constant 0 : index
    %c0_37 = arith.constant 0 : index
    %c0_38 = arith.constant 0 : index
    %94 = vector.load %arg2[%c2_34, %c0_35, %c0_36, %c0_37, %c0_38] : memref<4x4x4x4x81xf32, #tpu.memory_space<vmem>>, vector<1x4x4x4x81xf32>
    %95 = vector.shape_cast %94 : vector<1x4x4x4x81xf32> to vector<4x4x4x81xf32>
    %96 = vector.extract_strided_slice %93 {offsets = [0, 0, 0], sizes = [4, 1, 81], strides = [1, 1, 1]} : vector<4x4x81xf32> to vector<4x1x81xf32>
    %97 = vector.shape_cast %96 : vector<4x1x81xf32> to vector<4x81xf32>
    %98 = vector.shape_cast %97 : vector<4x81xf32> to vector<1x4x1x81xf32>
    %99 = vector.extract_strided_slice %95 {offsets = [0, 0, 0, 0], sizes = [4, 1, 4, 81], strides = [1, 1, 1, 1]} : vector<4x4x4x81xf32> to vector<4x1x4x81xf32>
    %100 = vector.shape_cast %99 : vector<4x1x4x81xf32> to vector<4x4x81xf32>
    %101 = vector.shape_cast %100 : vector<4x4x81xf32> to vector<4x1x4x81xf32>
    %102 = vector.broadcast %98 : vector<1x4x1x81xf32> to vector<4x4x4x81xf32>
    %103 = vector.broadcast %101 : vector<4x1x4x81xf32> to vector<4x4x4x81xf32>
    %104 = arith.mulf %102, %103 : vector<4x4x4x81xf32>
    %105 = vector.extract_strided_slice %93 {offsets = [0, 1, 0], sizes = [4, 1, 81], strides = [1, 1, 1]} : vector<4x4x81xf32> to vector<4x1x81xf32>
    %106 = vector.shape_cast %105 : vector<4x1x81xf32> to vector<4x81xf32>
    %107 = vector.shape_cast %106 : vector<4x81xf32> to vector<1x4x1x81xf32>
    %108 = vector.extract_strided_slice %95 {offsets = [0, 1, 0, 0], sizes = [4, 1, 4, 81], strides = [1, 1, 1, 1]} : vector<4x4x4x81xf32> to vector<4x1x4x81xf32>
    %109 = vector.shape_cast %108 : vector<4x1x4x81xf32> to vector<4x4x81xf32>
    %110 = vector.shape_cast %109 : vector<4x4x81xf32> to vector<4x1x4x81xf32>
    %111 = vector.broadcast %107 : vector<1x4x1x81xf32> to vector<4x4x4x81xf32>
    %112 = vector.broadcast %110 : vector<4x1x4x81xf32> to vector<4x4x4x81xf32>
    %113 = arith.mulf %111, %112 : vector<4x4x4x81xf32>
    %114 = arith.addf %104, %113 : vector<4x4x4x81xf32>
    %115 = vector.extract_strided_slice %93 {offsets = [0, 2, 0], sizes = [4, 1, 81], strides = [1, 1, 1]} : vector<4x4x81xf32> to vector<4x1x81xf32>
    %116 = vector.shape_cast %115 : vector<4x1x81xf32> to vector<4x81xf32>
    %117 = vector.shape_cast %116 : vector<4x81xf32> to vector<1x4x1x81xf32>
    %118 = vector.extract_strided_slice %95 {offsets = [0, 2, 0, 0], sizes = [4, 1, 4, 81], strides = [1, 1, 1, 1]} : vector<4x4x4x81xf32> to vector<4x1x4x81xf32>
    %119 = vector.shape_cast %118 : vector<4x1x4x81xf32> to vector<4x4x81xf32>
    %120 = vector.shape_cast %119 : vector<4x4x81xf32> to vector<4x1x4x81xf32>
    %121 = vector.broadcast %117 : vector<1x4x1x81xf32> to vector<4x4x4x81xf32>
    %122 = vector.broadcast %120 : vector<4x1x4x81xf32> to vector<4x4x4x81xf32>
    %123 = arith.mulf %121, %122 : vector<4x4x4x81xf32>
    %124 = arith.addf %114, %123 : vector<4x4x4x81xf32>
    %125 = vector.extract_strided_slice %93 {offsets = [0, 3, 0], sizes = [4, 1, 81], strides = [1, 1, 1]} : vector<4x4x81xf32> to vector<4x1x81xf32>
    %126 = vector.shape_cast %125 : vector<4x1x81xf32> to vector<4x81xf32>
    %127 = vector.shape_cast %126 : vector<4x81xf32> to vector<1x4x1x81xf32>
    %128 = vector.extract_strided_slice %95 {offsets = [0, 3, 0, 0], sizes = [4, 1, 4, 81], strides = [1, 1, 1, 1]} : vector<4x4x4x81xf32> to vector<4x1x4x81xf32>
    %129 = vector.shape_cast %128 : vector<4x1x4x81xf32> to vector<4x4x81xf32>
    %130 = vector.shape_cast %129 : vector<4x4x81xf32> to vector<4x1x4x81xf32>
    %131 = vector.broadcast %127 : vector<1x4x1x81xf32> to vector<4x4x4x81xf32>
    %132 = vector.broadcast %130 : vector<4x1x4x81xf32> to vector<4x4x4x81xf32>
    %133 = arith.mulf %131, %132 : vector<4x4x4x81xf32>
    %134 = arith.addf %124, %133 : vector<4x4x4x81xf32>
    %c0_39 = arith.constant 0 : index
    %c2_40 = arith.constant 2 : index
    %c0_41 = arith.constant 0 : index
    %c0_42 = arith.constant 0 : index
    %c0_43 = arith.constant 0 : index
    %c0_44 = arith.constant 0 : index
    %135 = vector.load %arg3[%c0_39, %c2_40, %c0_41, %c0_42, %c0_43, %c0_44] : memref<1x4x4x4x4x81xf32, #tpu.memory_space<vmem>>, vector<1x1x4x4x4x81xf32>
    %136 = vector.shape_cast %135 : vector<1x1x4x4x4x81xf32> to vector<4x4x4x81xf32>
    %137 = vector.shape_cast %134 : vector<4x4x4x81xf32> to vector<1x1x4x4x4x81xf32>
    tpu.vector_store %arg3[%c0_39, %c2_40, %c0_41, %c0_42, %c0_43, %c0_44], %137 {strides = array<i32>} : memref<1x4x4x4x4x81xf32, #tpu.memory_space<vmem>>, vector<1x1x4x4x4x81xf32>,
    %c0_45 = arith.constant 0 : index
    %c3 = arith.constant 3 : index
    %c0_46 = arith.constant 0 : index
    %c0_47 = arith.constant 0 : index
    %c0_48 = arith.constant 0 : index
    %138 = vector.load %arg1[%c0_45, %c3, %c0_46, %c0_47, %c0_48] : memref<1x4x4x4x81xf32, #tpu.memory_space<vmem>>, vector<1x1x4x4x81xf32>
    %139 = vector.shape_cast %138 : vector<1x1x4x4x81xf32> to vector<4x4x81xf32>
    %c3_49 = arith.constant 3 : index
    %c0_50 = arith.constant 0 : index
    %c0_51 = arith.constant 0 : index
    %c0_52 = arith.constant 0 : index
    %c0_53 = arith.constant 0 : index
    %140 = vector.load %arg2[%c3_49, %c0_50, %c0_51, %c0_52, %c0_53] : memref<4x4x4x4x81xf32, #tpu.memory_space<vmem>>, vector<1x4x4x4x81xf32>
    %141 = vector.shape_cast %140 : vector<1x4x4x4x81xf32> to vector<4x4x4x81xf32>
    %142 = vector.extract_strided_slice %139 {offsets = [0, 0, 0], sizes = [4, 1, 81], strides = [1, 1, 1]} : vector<4x4x81xf32> to vector<4x1x81xf32>
    %143 = vector.shape_cast %142 : vector<4x1x81xf32> to vector<4x81xf32>
    %144 = vector.shape_cast %143 : vector<4x81xf32> to vector<1x4x1x81xf32>
    %145 = vector.extract_strided_slice %141 {offsets = [0, 0, 0, 0], sizes = [4, 1, 4, 81], strides = [1, 1, 1, 1]} : vector<4x4x4x81xf32> to vector<4x1x4x81xf32>
    %146 = vector.shape_cast %145 : vector<4x1x4x81xf32> to vector<4x4x81xf32>
    %147 = vector.shape_cast %146 : vector<4x4x81xf32> to vector<4x1x4x81xf32>
    %148 = vector.broadcast %144 : vector<1x4x1x81xf32> to vector<4x4x4x81xf32>
    %149 = vector.broadcast %147 : vector<4x1x4x81xf32> to vector<4x4x4x81xf32>
    %150 = arith.mulf %148, %149 : vector<4x4x4x81xf32>
    %151 = vector.extract_strided_slice %139 {offsets = [0, 1, 0], sizes = [4, 1, 81], strides = [1, 1, 1]} : vector<4x4x81xf32> to vector<4x1x81xf32>
    %152 = vector.shape_cast %151 : vector<4x1x81xf32> to vector<4x81xf32>
    %153 = vector.shape_cast %152 : vector<4x81xf32> to vector<1x4x1x81xf32>
    %154 = vector.extract_strided_slice %141 {offsets = [0, 1, 0, 0], sizes = [4, 1, 4, 81], strides = [1, 1, 1, 1]} : vector<4x4x4x81xf32> to vector<4x1x4x81xf32>
    %155 = vector.shape_cast %154 : vector<4x1x4x81xf32> to vector<4x4x81xf32>
    %156 = vector.shape_cast %155 : vector<4x4x81xf32> to vector<4x1x4x81xf32>
    %157 = vector.broadcast %153 : vector<1x4x1x81xf32> to vector<4x4x4x81xf32>
    %158 = vector.broadcast %156 : vector<4x1x4x81xf32> to vector<4x4x4x81xf32>
    %159 = arith.mulf %157, %158 : vector<4x4x4x81xf32>
    %160 = arith.addf %150, %159 : vector<4x4x4x81xf32>
    %161 = vector.extract_strided_slice %139 {offsets = [0, 2, 0], sizes = [4, 1, 81], strides = [1, 1, 1]} : vector<4x4x81xf32> to vector<4x1x81xf32>
    %162 = vector.shape_cast %161 : vector<4x1x81xf32> to vector<4x81xf32>
    %163 = vector.shape_cast %162 : vector<4x81xf32> to vector<1x4x1x81xf32>
    %164 = vector.extract_strided_slice %141 {offsets = [0, 2, 0, 0], sizes = [4, 1, 4, 81], strides = [1, 1, 1, 1]} : vector<4x4x4x81xf32> to vector<4x1x4x81xf32>
    %165 = vector.shape_cast %164 : vector<4x1x4x81xf32> to vector<4x4x81xf32>
    %166 = vector.shape_cast %165 : vector<4x4x81xf32> to vector<4x1x4x81xf32>
    %167 = vector.broadcast %163 : vector<1x4x1x81xf32> to vector<4x4x4x81xf32>
    %168 = vector.broadcast %166 : vector<4x1x4x81xf32> to vector<4x4x4x81xf32>
    %169 = arith.mulf %167, %168 : vector<4x4x4x81xf32>
    %170 = arith.addf %160, %169 : vector<4x4x4x81xf32>
    %171 = vector.extract_strided_slice %139 {offsets = [0, 3, 0], sizes = [4, 1, 81], strides = [1, 1, 1]} : vector<4x4x81xf32> to vector<4x1x81xf32>
    %172 = vector.shape_cast %171 : vector<4x1x81xf32> to vector<4x81xf32>
    %173 = vector.shape_cast %172 : vector<4x81xf32> to vector<1x4x1x81xf32>
    %174 = vector.extract_strided_slice %141 {offsets = [0, 3, 0, 0], sizes = [4, 1, 4, 81], strides = [1, 1, 1, 1]} : vector<4x4x4x81xf32> to vector<4x1x4x81xf32>
    %175 = vector.shape_cast %174 : vector<4x1x4x81xf32> to vector<4x4x81xf32>
    %176 = vector.shape_cast %175 : vector<4x4x81xf32> to vector<4x1x4x81xf32>
    %177 = vector.broadcast %173 : vector<1x4x1x81xf32> to vector<4x4x4x81xf32>
    %178 = vector.broadcast %176 : vector<4x1x4x81xf32> to vector<4x4x4x81xf32>
    %179 = arith.mulf %177, %178 : vector<4x4x4x81xf32>
    %180 = arith.addf %170, %179 : vector<4x4x4x81xf32>
    %c0_54 = arith.constant 0 : index
    %c3_55 = arith.constant 3 : index
    %c0_56 = arith.constant 0 : index
    %c0_57 = arith.constant 0 : index
    %c0_58 = arith.constant 0 : index
    %c0_59 = arith.constant 0 : index
    %181 = vector.load %arg3[%c0_54, %c3_55, %c0_56, %c0_57, %c0_58, %c0_59] : memref<1x4x4x4x4x81xf32, #tpu.memory_space<vmem>>, vector<1x1x4x4x4x81xf32>
    %182 = vector.shape_cast %181 : vector<1x1x4x4x4x81xf32> to vector<4x4x4x81xf32>
    %183 = vector.shape_cast %180 : vector<4x4x4x81xf32> to vector<1x1x4x4x4x81xf32>
    tpu.vector_store %arg3[%c0_54, %c3_55, %c0_56, %c0_57, %c0_58, %c0_59], %183 {strides = array<i32>} : memref<1x4x4x4x4x81xf32, #tpu.memory_space<vmem>>, vector<1x1x4x4x4x81xf32>,
    return
  }
  func.func @transform_0(%arg0: i32) -> (i32, i32, i32, i32, i32) {
    %c0_i32 = arith.constant 0 : i32
    %c0_i32_0 = arith.constant 0 : i32
    %c0_i32_1 = arith.constant 0 : i32
    %c0_i32_2 = arith.constant 0 : i32
    %c0_i32_3 = arith.constant 0 : i32
    return %arg0, %c0_i32, %c0_i32_0, %c0_i32_1, %c0_i32_2 : i32, i32, i32, i32, i32
  }
  func.func @transform_1(%arg0: i32) -> (i32, i32, i32, i32, i32) {
    %c0_i32 = arith.constant 0 : i32
    %c0_i32_0 = arith.constant 0 : i32
    %c0_i32_1 = arith.constant 0 : i32
    %c0_i32_2 = arith.constant 0 : i32
    %c0_i32_3 = arith.constant 0 : i32
    %c0_i32_4 = arith.constant 0 : i32
    return %c0_i32, %c0_i32_0, %c0_i32_1, %c0_i32_2, %c0_i32_3 : i32, i32, i32, i32, i32
  }
  func.func @transform_2(%arg0: i32) -> (i32, i32, i32, i32, i32, i32) {
    %c0_i32 = arith.constant 0 : i32
    %c0_i32_0 = arith.constant 0 : i32
    %c0_i32_1 = arith.constant 0 : i32
    %c0_i32_2 = arith.constant 0 : i32
    %c0_i32_3 = arith.constant 0 : i32
    %c0_i32_4 = arith.constant 0 : i32
    return %arg0, %c0_i32, %c0_i32_0, %c0_i32_1, %c0_i32_2, %c0_i32_3 : i32, i32, i32, i32, i32, i32
  }
}

</mosaic_0001>

<bundles_post_ra>
// kernel: tpu_custom_call.1
= control target key start
LH: loop header
LB: loop body
LE: loop exit
PB: predicated region body
PF: predicated region fallthrough
CT: control target
= control target key end

     0   :  { %7 = vsyncpa [#allocation3], 0  ;;  %s2236_s0 = inlined_call_operand.hbm [shape: f32[2,4,4,4,81], index: 0, kind: input, shape index: {}]   ;;  %s2237_s1 = inlined_call_operand.hbm [shape: f32[4,4,4,4,81], index: 1, kind: input, shape index: {}]   ;;  %s2238_s2 = inlined_call_operand.hbm [shape: f32[2,4,4,4,4,81], index: 2, kind: output, shape index: {}]  }
   0x1   :  { %9 = vsyncpa [#allocation3 + $0x1], 0 }
   0x2   :  { %10 = vsyncpa [#allocation6], 0 }
   0x3   :  { %11 = vsyncpa [#allocation4], 0 }
   0x4   :  { %13 = vsyncpa [#allocation4 + $0x1], 0  ;;  %s1423_s9 = smov 0   ;;  %s1425_s10 = smov 0  }
   0x5   :  { %s1427_s11 = smov 0   ;;  %s1429_s12 = smov 0  }
   0x6 LB: > { %s1444_s13 = sadd.s32 4294967295, %s1399_s12   ;;  %s1132_s14 = sadd.s32 4294967294, %s1399_s12   ;;  %s1399_s12 = sphi %s1429_s12, %s2258_s12   ;;  %s1395_s11 = sphi %s1427_s11, %s2257_s11   ;;  %s1391_s10 = sphi %s1425_s10, %s2256_s10   ;;  %s1387_s9 = sphi %s1423_s9, %s2255_s9  }
   0x7   : > { %p39_p0 = scmp.ne.s32.totalorder %s1391_s10, %s1387_s9  ;;  %p2239_p1 = scmp.eq.s32.totalorder %s1444_s13, 0 }
   0x8   : > { %p90_p3 = scmp.eq.s32.totalorder %s1132_s14, 1  ;;  %p1133_p5 = scmp.ge.s32.totalorder %s1399_s12, 1 }
   0x9   : > { %p1453_p4 = por %p2239_p1, %p39_p0  ;;  %p97_p7 = scmp.lt.s32.totalorder %s1399_s12, 3 }
   0xa   : > { %p1458_p6 = por %p90_p3, %p39_p0  ;;  %s1401_s18 = smov [#allocation5]  }
   0xb   : > { %s2242_s15 = scalar_select %p1453_p4, 1, 0 }
   0xc   : > { %s2243_s16 = scalar_select %p1458_p6, 1, 0 }
   0xd   : > { %p1463_p8 = pnand %p1133_p5, %p97_p7  ;;  %s109_s19 = sshll.u32 %s1401_s18, 4  ;;  %s1467_s19 = int_to_ptr.vmem [resolvable:$true] %s109_s19 }
   0xe   : > { %s1479_s21 = sadd.s32 1, %s1399_s12   ;;  %s26_s22 = sadd.s32 1, %s1395_s11 }
   0xf   : > { %s2244_s17 = scalar_select %p1463_p8, 1, 0 }
  0x10   : > { %p1218_p9 = pneg %p1463_p8  ;;  %s23_s23 = ssub.s32 %s1399_s12, %s1479_s21 }
  0x11   : > { %s1271_s26 = scalar_lea.hbm %s2237_s1, 4096 }
  0x12   : > { %p1474_p11 = pnand %p1218_p9, %p2239_p1  ;;  %p1272_p12 = scmp.ne.s32.totalorder %s2237_s1, %s1271_s26 }
  0x13   : > { %p1278_p5 = scmp.lt.u32.totalorder %s1271_s26, %s2237_s1 }
  0x14   : > { %p1273_p13 = pneg %p1474_p11 }
  0x16   : > { %p1274_p0 = pnand %p1273_p13, %p1272_p12 }
  0x18   : > { %p1275_p3 = pneg %p1274_p0 }
  0x1a   : > { %p1280_p7 = pnand %p1278_p5, %p1275_p3 }
  0x1c   : > { %1283 = shalt.err (!%p1280_p7)
}
  0x1d   : > { %s1284_s3 = scalar_lea.vmem %s1467_s19, 4096  ;;  %p1292_p2 = scmp.lt.s32.totalorder %s1467_s19, %s1467_s19 }
  0x1e   : > { %p1285_p9 = scmp.ne.s32.totalorder %s1467_s19, %s1284_s3  ;;  %p1293_p6 = scmp.lt.s32.totalorder %s1284_s3, %s1284_s3 }
  0x20   : > { %p1287_p10 = pnand %p1285_p9, %p1273_p13  ;;  %p1294_p4 = por %p1293_p6, %p1292_p2 }
  0x22   : > { %p1288_p1 = pneg %p1287_p10 }
  0x24   : > { %p1295_p8 = pnand %p1294_p4, %p1288_p1 }
  0x26   : > { %1298 = shalt.err (!%p1295_p8)
}
  0x27   : > { %s1402_s4 = smov 64   ;;  %s1403_s5 = smov 4  }
  0x28   : > { %1221 = dma.hbm_to_vmem [thread:$0]  (!%p1474_p11), %s2237_s1, 4096, %s1467_s19, [#allocation6], %s1402_s4, %s1402_s4, %s1403_s5  }
  0x29   : > { %p24_p1 = scmp.eq.s32.totalorder %s23_s23, 0  ;;  %p33_p2 = scmp.ne.s32.totalorder %s1395_s11, %s1391_s10 }
  0x2a   : > { %p34_p4 = scmp.eq.s32.totalorder %s1399_s12, 0  ;;  %p1231_p6 = scmp.lt.s32.totalorder %s1399_s12, 2 }
  0x2b   : > { %s1513_s8 = scalar_select %p24_p1, %s1395_s11, %s26_s22  }
  0x2c   : > { %p35_p8 = por %p34_p4, %p33_p2  ;;  %p2246_p10 = scmp.eq.s32.totalorder %s1444_s13, 1 }
  0x2d   : > { %s123_s18 = sand.u32 1, %s1395_s11   ;;  %s1208_s20 = sshll.u32 %s1399_s12, 10 }
  0x2e   : > { %p1517_p12 = por %p2246_p10, %p33_p2  ;;  %s1136_s24 = sshll.u32 %s123_s18, 6 }
  0x2f   : > { %s1526_s27 = scalar_lea.hbm %s2236_s0, %s1208_s20  ;;  %s127_s19 = scalar_lea.vmem [#allocation2], %s1136_s24 }
  0x30   : > { %s134_s22 = sshll.u32 %s127_s19, 4  ;;  %p1528_p11 = pnand %p1231_p6, %p35_p8  ;;  %s1532_s22 = int_to_ptr.vmem [resolvable:$true] %s134_s22 }
  0x31   : > { %s1534_s28 = scalar_lea.sflag [#allocation3], %s123_s18  ;;  %s1299_s29 = scalar_lea.hbm %s1526_s27, 1024 }
  0x32   : > { %p1300_p13 = scmp.ne.s32.totalorder %s1526_s27, %s1299_s29  ;;  %p1301_p0 = pneg %p1528_p11 }
  0x33   : > { %s1304_s6 = scalar_lea.hbm %s2236_s0, 2048  ;;  %p1305_p7 = scmp.lt.u32.totalorder %s1526_s27, %s2236_s0 }
  0x34   : > { %p1302_p3 = pnand %p1301_p0, %p1300_p13  ;;  %p1306_p9 = scmp.lt.u32.totalorder %s1304_s6, %s1299_s29 }
  0x35   : > { %p1308_p2 = scmp.lt.u32.totalorder %s1299_s29, %s1526_s27 }
  0x36   : > { %p1303_p5 = pneg %p1302_p3  ;;  %p1307_p1 = por %p1306_p9, %p1305_p7 }
  0x38   : > { %p1309_p4 = por %p1308_p2, %p1307_p1 }
  0x3a   : > { %p1310_p6 = pnand %p1309_p4, %p1303_p5 }
  0x3c   : > { %1313 = shalt.err (!%p1310_p6)
}
  0x3d   : > { %s1314_s18 = scalar_lea.vmem %s1532_s22, 1024  ;;  %s1404_s24 = smov [#allocation2]  }
  0x3e   : > { %p1315_p8 = scmp.ne.s32.totalorder %s1532_s22, %s1314_s18  ;;  %s1319_s25 = sshll.u32 %s1404_s24, 4  ;;  %s1320_s25 = int_to_ptr.vmem [resolvable:$false] %s1319_s25 }
  0x3f   : > { %s1321_s26 = scalar_lea.vmem %s1320_s25, 2048  ;;  %p1322_p3 = scmp.lt.s32.totalorder %s1532_s22, %s1320_s25 }
  0x40   : > { %p1317_p10 = pnand %p1315_p8, %p1301_p0  ;;  %p1323_p7 = scmp.lt.s32.totalorder %s1321_s26, %s1314_s18 }
  0x42   : > { %p1318_p13 = pneg %p1317_p10  ;;  %p1324_p9 = por %p1323_p7, %p1322_p3 }
  0x44   : > { %p1325_p1 = pnand %p1324_p9, %p1318_p13 }
  0x46   : > { %1328 = shalt.err (!%p1325_p1)
}
  0x47   : > { %1225 = dma.hbm_to_vmem [thread:$0]  (!%p1528_p11), %s1526_s27, 1024, %s1532_s22, %s1534_s28, %s1402_s4, %s1402_s4, %s1403_s5  }
  0x48   : > { %p2249_p0 = scmp.ne.s32.totalorder %s2244_s17, 0 }
  0x49   : > { %s1568_s19 = sand.u32 (!%p2249_p0), 1, %s1391_s10   ;;  %p2250_p5 = scmp.ne.s32.totalorder (!%p2249_p0), %s2242_s15, 0 }
  0x4a   : > { %146 = sbr.rel (%p2249_p0) target bundleno = 239 (0xef), region = 28  ;;  %s1140_s29 = sshll.u32 (!%p2249_p0), %s1568_s19, 6 }
  0x4b   : > { %s149_s30 = scalar_lea.sflag (!%p2249_p0), [#allocation3], %s1568_s19  ;;  %s1572_s3 = scalar_lea.vmem (!%p2249_p0), [#allocation2], %s1140_s29 }
  0x51   : > { %1374 = dma.done.wait (%p2250_p5), %s149_s30, 1024  }
  0x52   : > { %1376 = vsyncadd (%p2250_p5), %s149_s30, 4294966272  ;;  %p2251_p11 = scmp.eq.s32.totalorder %s1444_s13, 0 }
  0x54   : > { %1378 = dma.done.wait (%p2251_p11), [#allocation6], 4096   ;;  %p2252_p2 = pmov %p2251_p11 }
  0x55   : > { %v197_v0 = vlaneseq  ;;  %v177_v6 = vld [vmem:[%s1572_s3] sm:$0xf]  ;;  %v182_v8 = vld [vmem:[#allocation5 + $0x4] sm:$0xf]  ;;  %vm373_vm0 = vcmask 658432   ;;  %s1142_s15 = sshll.u32 %s1568_s19, 8 }
  0x56   : > { %1380 = vsyncadd (%p2252_p2), [#allocation6], 4294963200  ;;  %v181_v7 = vld [vmem:[#allocation5] sm:$0xf]  ;;  %v183_v9 = vld [vmem:[#allocation5 + $0x8] sm:$0xf] }
  0x57   : > { %v198_v1 = vshrl.u32 %v197_v0, 7  ;;  %v184_v10 = vld [vmem:[#allocation5 + $0xc] sm:$0xf]  ;;  %v178_v15 = vld [vmem:[%s1572_s3 + $0x4] sm:$0xf]  ;;  %s1659_s17 = scalar_lea.vmem [#allocation7], %s1142_s15 }
  0x58   : > { %v179_v20 = vld [vmem:[%s1572_s3 + $0x8] sm:$0xf]  ;;  %v180_v25 = vld [vmem:[%s1572_s3 + $0xc] sm:$0xf]  ;;  %v185_v42 = vld [vmem:[#allocation5 + $0x10] sm:$0xf] }
  0x59   : > { %v1582_v2 = vsub.s32 0, %v198_v1  ;;  %v1584_v3 = vsub.s32 1, %v198_v1  ;;  %v1586_v4 = vsub.s32 2, %v198_v1  ;;  %v1588_v5 = vsub.s32 3, %v198_v1  ;;  %v186_v43 = vld [vmem:[#allocation5 + $0x14] sm:$0xf] }
  0x5a   : > { %v187_v48 = vld [vmem:[#allocation5 + $0x18] sm:$0xf]  ;;  %v188_v53 = vld [vmem:[#allocation5 + $0x1c] sm:$0xf]  ;;  %s1209_s4 = sshll.u32 %s1444_s13, 12  ;;  %s1049_s5 = sshll.u32 %s1659_s17, 4  ;;  %s2188_s5 = int_to_ptr.vmem [resolvable:$true] %s1049_s5 }
  0x5b   : > { %v1592_v11 = vrot.slane %v177_v6, %v1582_v2  ;;  %v1595_v12 = vrot.slane %v177_v6, %v1584_v3  ;;  %v1598_v13 = vrot.slane %v177_v6, %v1586_v4  ;;  %v1601_v14 = vrot.slane %v177_v6, %v1588_v5  ;;  %s2186_s23 = scalar_lea.hbm %s2238_s2, %s1209_s4  ;;  %s1036_s13 = scalar_lea.sflag [#allocation4], %s1568_s19 }
  0x5c   : > { %v1605_v16 = vrot.slane %v178_v15, %v1582_v2  ;;  %v1608_v17 = vrot.slane %v178_v15, %v1584_v3  ;;  %v1611_v18 = vrot.slane %v178_v15, %v1586_v4  ;;  %v1614_v19 = vrot.slane %v178_v15, %v1588_v5  ;;  %s1329_s28 = scalar_lea.vmem %s2188_s5, 4096  ;;  %s1405_s6 = smov [#allocation7]  }
  0x5d   : > { %v213_v21 = vmul.f32 %v1592_v11, %v181_v7  ;;  %v245_v22 = vmul.f32 %v1595_v12, %v182_v8  ;;  %v293_v23 = vmul.f32 %v1598_v13, %v183_v9  ;;  %v341_v24 = vmul.f32 %v1601_v14, %v184_v10  ;;  %p1330_p4 = scmp.ne.s32.totalorder %s2188_s5, %s1329_s28  ;;  %s1333_s7 = sshll.u32 %s1405_s6, 4  ;;  %s1334_s7 = int_to_ptr.vmem [resolvable:$false] %s1333_s7 }
  0x5e   : > { %v214_v26 = vmul.f32 %v1605_v16, %v181_v7  ;;  %v246_v27 = vmul.f32 %v1608_v17, %v182_v8  ;;  %v294_v28 = vmul.f32 %v1611_v18, %v183_v9  ;;  %v342_v29 = vmul.f32 %v1614_v19, %v184_v10  ;;  %s1335_s20 = scalar_lea.vmem %s1334_s7, 8192  ;;  %p1336_p10 = scmp.lt.s32.totalorder %s2188_s5, %s1334_s7 }
  0x5f   : > { %v261_v30 = vadd.f32 %v245_v22, %v213_v21  ;;  %v1628_v31 = vrot.slane %v179_v20, %v1582_v2  ;;  %v1631_v32 = vrot.slane %v179_v20, %v1584_v3  ;;  %v1634_v33 = vrot.slane %v179_v20, %v1586_v4  ;;  %v189_v22 = vld [vmem:[#allocation5 + $0x20] sm:$0xf]  ;;  %p1331_p6 = pnand %p1330_p4, %p1517_p12  ;;  %p1337_p13 = scmp.lt.s32.totalorder %s1335_s20, %s1329_s28 }
  0x60   : > { %v262_v34 = vadd.f32 %v246_v27, %v214_v26  ;;  %v1637_v35 = vrot.slane %v179_v20, %v1588_v5  ;;  %v1640_v36 = vrot.slane %v180_v25, %v1582_v2  ;;  %v1643_v37 = vrot.slane %v180_v25, %v1584_v3 }
  0x61   : > { %v309_v38 = vadd.f32 %v293_v23, %v261_v30  ;;  %v215_v39 = vmul.f32 %v1628_v31, %v181_v7  ;;  %v247_v40 = vmul.f32 %v1631_v32, %v182_v8  ;;  %v295_v41 = vmul.f32 %v1634_v33, %v183_v9  ;;  %v190_v23 = vld [vmem:[#allocation5 + $0x24] sm:$0xf]  ;;  %p1332_p8 = pneg %p1331_p6  ;;  %p1338_p3 = por %p1337_p13, %p1336_p10 }
  0x62   : > { %v310_v44 = vadd.f32 %v294_v28, %v262_v34  ;;  %v343_v45 = vmul.f32 %v1637_v35, %v184_v10  ;;  %v216_v46 = vmul.f32 %v1640_v36, %v181_v7  ;;  %v248_v47 = vmul.f32 %v1643_v37, %v182_v8  ;;  %v191_v28 = vld [vmem:[#allocation5 + $0x28] sm:$0xf] }
  0x63   : > { %v357_v49 = vadd.f32 %v341_v24, %v309_v38  ;;  %v263_v50 = vadd.f32 %v247_v40, %v215_v39  ;;  %v1652_v51 = vrot.slane %v180_v25, %v1586_v4  ;;  %v1655_v52 = vrot.slane %v180_v25, %v1588_v5  ;;  %v192_v39 = vld [vmem:[#allocation5 + $0x2c] sm:$0xf]  ;;  %p1339_p7 = pnand %p1338_p3, %p1332_p8 }
  0x64   : > { %v358_v54 = vadd.f32 %v342_v29, %v310_v44  ;;  %v264_v55 = vadd.f32 %v248_v47, %v216_v46  ;;  %v217_v56 = vmul.f32 %v1592_v11, %v185_v42  ;;  %v249_v57 = vmul.f32 %v1595_v12, %v186_v43 }
  0x65   : > { %374 = vst.msk [vmem:[%s1659_s17] sm:$0xf] %vm373_vm0, %v357_v49  ;;  %v311_v58 = vadd.f32 %v295_v41, %v263_v50  ;;  %v296_v59 = vmul.f32 %v1652_v51, %v183_v9  ;;  %v344_v60 = vmul.f32 %v1655_v52, %v184_v10  ;;  %v297_v61 = vmul.f32 %v1598_v13, %v187_v48 }
  0x66   : > { %375 = vst.msk [vmem:[%s1659_s17 + $0x4] sm:$0xf] %vm373_vm0, %v358_v54  ;;  %v265_v62 = vadd.f32 %v249_v57, %v217_v56  ;;  %v345_v63 = vmul.f32 %v1601_v14, %v188_v53  ;;  %v218_v0 = vmul.f32 %v1605_v16, %v185_v42  ;;  %v250_v1 = vmul.f32 %v1608_v17, %v186_v43 }
  0x67   : > { %v359_v6 = vadd.f32 %v343_v45, %v311_v58  ;;  %v312_v7 = vadd.f32 %v296_v59, %v264_v55  ;;  %v298_v8 = vmul.f32 %v1611_v18, %v187_v48  ;;  %v346_v9 = vmul.f32 %v1614_v19, %v188_v53 }
  0x68   : > { %v313_v15 = vadd.f32 %v297_v61, %v265_v62  ;;  %v266_v10 = vadd.f32 %v250_v1, %v218_v0  ;;  %v219_v20 = vmul.f32 %v1628_v31, %v185_v42  ;;  %v251_v21 = vmul.f32 %v1631_v32, %v186_v43  ;;  %v193_v62 = vld [vmem:[#allocation5 + $0x30] sm:$0xf] }
  0x69   : > { %376 = vst.msk [vmem:[%s1659_s17 + $0x8] sm:$0xf] %vm373_vm0, %v359_v6  ;;  %v360_v24 = vadd.f32 %v344_v60, %v312_v7  ;;  %v299_v25 = vmul.f32 %v1634_v33, %v187_v48  ;;  %v347_v26 = vmul.f32 %v1637_v35, %v188_v53  ;;  %v220_v27 = vmul.f32 %v1640_v36, %v185_v42 }
  0x6a   : > { %v361_v29 = vadd.f32 %v345_v63, %v313_v15  ;;  %v314_v30 = vadd.f32 %v298_v8, %v266_v10  ;;  %v267_v34 = vadd.f32 %v251_v21, %v219_v20  ;;  %v252_v38 = vmul.f32 %v1643_v37, %v186_v43  ;;  %v194_v63 = vld [vmem:[#allocation5 + $0x34] sm:$0xf]  ;;  %v195_v8 = vld [vmem:[#allocation5 + $0x38] sm:$0xf]  ;;  %v196_v21 = vld [vmem:[#allocation5 + $0x3c] sm:$0xf] }
  0x6b   : > { %377 = vst.msk [vmem:[%s1659_s17 + $0xc] sm:$0xf] %vm373_vm0, %v360_v24  ;;  %v300_v40 = vmul.f32 %v1652_v51, %v187_v48  ;;  %v348_v41 = vmul.f32 %v1655_v52, %v188_v53  ;;  %v221_v44 = vmul.f32 %v1592_v11, %v189_v22  ;;  %v253_v45 = vmul.f32 %v1595_v12, %v190_v23 }
  0x6c   : > { %378 = vst.msk [vmem:[%s1659_s17 + $0x10] sm:$0xf] %vm373_vm0, %v361_v29  ;;  %v362_v42 = vadd.f32 %v346_v9, %v314_v30  ;;  %v315_v46 = vadd.f32 %v299_v25, %v267_v34  ;;  %v268_v47 = vadd.f32 %v252_v38, %v220_v27  ;;  %v301_v49 = vmul.f32 %v1598_v13, %v191_v28 }
  0x6d   : > { %v269_v43 = vadd.f32 %v253_v45, %v221_v44  ;;  %v349_v50 = vmul.f32 %v1601_v14, %v192_v39  ;;  %v222_v54 = vmul.f32 %v1605_v16, %v189_v22  ;;  %v254_v48 = vmul.f32 %v1608_v17, %v190_v23 }
  0x6e   : > { %379 = vst.msk [vmem:[%s1659_s17 + $0x14] sm:$0xf] %vm373_vm0, %v362_v42  ;;  %v363_v53 = vadd.f32 %v347_v26, %v315_v46  ;;  %v316_v55 = vadd.f32 %v300_v40, %v268_v47  ;;  %v302_v56 = vmul.f32 %v1611_v18, %v191_v28  ;;  %v350_v57 = vmul.f32 %v1614_v19, %v192_v39  ;;  %v1143_v42 = vld [vmem:[%s1572_s3 + $0x10] sm:$0xf] }
  0x6f   : > { %v317_v58 = vadd.f32 %v301_v49, %v269_v43  ;;  %v270_v59 = vadd.f32 %v254_v48, %v222_v54  ;;  %v223_v60 = vmul.f32 %v1628_v31, %v189_v22  ;;  %v255_v61 = vmul.f32 %v1631_v32, %v190_v23  ;;  %v1144_v54 = vld [vmem:[%s1572_s3 + $0x14] sm:$0xf]  ;;  %v398_v48 = vld [vmem:[#allocation5 + $0x48] sm:$0xf] }
  0x70   : > { %380 = vst.msk [vmem:[%s1659_s17 + $0x18] sm:$0xf] %vm373_vm0, %v363_v53  ;;  %v364_v0 = vadd.f32 %v348_v41, %v316_v55  ;;  %v303_v1 = vmul.f32 %v1634_v33, %v191_v28  ;;  %v351_v6 = vmul.f32 %v1637_v35, %v192_v39  ;;  %v224_v7 = vmul.f32 %v1640_v36, %v189_v22 }
  0x71   : > { %v365_v9 = vadd.f32 %v349_v50, %v317_v58  ;;  %v318_v15 = vadd.f32 %v302_v56, %v270_v59  ;;  %v271_v10 = vadd.f32 %v255_v61, %v223_v60  ;;  %v256_v20 = vmul.f32 %v1643_v37, %v190_v23  ;;  %v396_v50 = vld [vmem:[#allocation5 + $0x40] sm:$0xf]  ;;  %v399_v56 = vld [vmem:[#allocation5 + $0x4c] sm:$0xf]  ;;  %v1145_v60 = vld [vmem:[%s1572_s3 + $0x18] sm:$0xf] }
  0x72   : > { %381 = vst.msk [vmem:[%s1659_s17 + $0x1c] sm:$0xf] %vm373_vm0, %v364_v0  ;;  %v304_v24 = vmul.f32 %v1652_v51, %v191_v28  ;;  %v352_v25 = vmul.f32 %v1655_v52, %v192_v39  ;;  %v225_v26 = vmul.f32 %v1592_v11, %v193_v62  ;;  %v257_v27 = vmul.f32 %v1595_v12, %v194_v63 }
  0x73   : > { %382 = vst.msk [vmem:[%s1659_s17 + $0x20] sm:$0xf] %vm373_vm0, %v365_v9  ;;  %v366_v22 = vadd.f32 %v350_v57, %v318_v15  ;;  %v319_v29 = vadd.f32 %v303_v1, %v271_v10  ;;  %v272_v30 = vadd.f32 %v256_v20, %v224_v7  ;;  %v305_v23 = vmul.f32 %v1598_v13, %v195_v8 }
  0x74   : > { %v273_v34 = vadd.f32 %v257_v27, %v225_v26  ;;  %v353_v38 = vmul.f32 %v1601_v14, %v196_v21  ;;  %v226_v28 = vmul.f32 %v1605_v16, %v193_v62  ;;  %v258_v39 = vmul.f32 %v1608_v17, %v194_v63 }
  0x75   : > { %383 = vst.msk [vmem:[%s1659_s17 + $0x24] sm:$0xf] %vm373_vm0, %v366_v22  ;;  %v367_v11 = vadd.f32 %v351_v6, %v319_v29  ;;  %v320_v12 = vadd.f32 %v304_v24, %v272_v30  ;;  %v306_v40 = vmul.f32 %v1611_v18, %v195_v8  ;;  %v354_v41 = vmul.f32 %v1614_v19, %v196_v21 }
  0x76   : > { %v321_v44 = vadd.f32 %v305_v23, %v273_v34  ;;  %v274_v45 = vadd.f32 %v258_v39, %v226_v28  ;;  %v227_v13 = vmul.f32 %v1628_v31, %v193_v62  ;;  %v259_v14 = vmul.f32 %v1631_v32, %v194_v63  ;;  %v397_v31 = vld [vmem:[#allocation5 + $0x44] sm:$0xf]  ;;  %v400_v34 = vld [vmem:[#allocation5 + $0x50] sm:$0xf] }
  0x77   : > { %384 = vst.msk [vmem:[%s1659_s17 + $0x28] sm:$0xf] %vm373_vm0, %v367_v11  ;;  %v368_v16 = vadd.f32 %v352_v25, %v320_v12  ;;  %v307_v17 = vmul.f32 %v1634_v33, %v195_v8  ;;  %v355_v46 = vmul.f32 %v1637_v35, %v196_v21  ;;  %v228_v18 = vmul.f32 %v1640_v36, %v193_v62  ;;  %v401_v12 = vld [vmem:[#allocation5 + $0x54] sm:$0xf] }
  0x78   : > { %v369_v19 = vadd.f32 %v353_v38, %v321_v44  ;;  %v322_v47 = vadd.f32 %v306_v40, %v274_v45  ;;  %v275_v49 = vadd.f32 %v259_v14, %v227_v13  ;;  %v260_v43 = vmul.f32 %v1643_v37, %v194_v63  ;;  %v402_v13 = vld [vmem:[#allocation5 + $0x58] sm:$0xf]  ;;  %v403_v14 = vld [vmem:[#allocation5 + $0x5c] sm:$0xf] }
  0x79   : > { %385 = vst.msk [vmem:[%s1659_s17 + $0x2c] sm:$0xf] %vm373_vm0, %v368_v16  ;;  %v308_v32 = vmul.f32 %v1652_v51, %v195_v8  ;;  %v356_v33 = vmul.f32 %v1655_v52, %v196_v21  ;;  %v1736_v35 = vrot.slane %v1143_v42, %v1582_v2  ;;  %v1739_v36 = vrot.slane %v1143_v42, %v1584_v3  ;;  %v1146_v21 = vld [vmem:[%s1572_s3 + $0x1c] sm:$0xf] }
  0x7a   : > { %386 = vst.msk [vmem:[%s1659_s17 + $0x30] sm:$0xf] %vm373_vm0, %v369_v19  ;;  %v370_v37 = vadd.f32 %v354_v41, %v322_v47  ;;  %v323_v53 = vadd.f32 %v307_v17, %v275_v49  ;;  %v276_v55 = vadd.f32 %v260_v43, %v228_v18  ;;  %v1744_v57 = vrot.slane %v1143_v42, %v1586_v4 }
  0x7b   : > { %v428_v51 = vmul.f32 %v1736_v35, %v396_v50  ;;  %v460_v52 = vmul.f32 %v1739_v36, %v397_v31  ;;  %v1749_v58 = vrot.slane %v1143_v42, %v1588_v5  ;;  %v1752_v59 = vrot.slane %v1144_v54, %v1582_v2 }
  0x7c   : > { %387 = vst.msk [vmem:[%s1659_s17 + $0x34] sm:$0xf] %vm373_vm0, %v370_v37  ;;  %v371_v61 = vadd.f32 %v355_v46, %v323_v53  ;;  %v324_v62 = vadd.f32 %v308_v32, %v276_v55  ;;  %v508_v63 = vmul.f32 %v1744_v57, %v398_v48  ;;  %v1759_v0 = vrot.slane %v1144_v54, %v1584_v3 }
  0x7d   : > { %v476_v1 = vadd.f32 %v460_v52, %v428_v51  ;;  %v556_v6 = vmul.f32 %v1749_v58, %v399_v56  ;;  %v429_v7 = vmul.f32 %v1752_v59, %v396_v50  ;;  %v1764_v8 = vrot.slane %v1144_v54, %v1586_v4 }
  0x7e   : > { %388 = vst.msk [vmem:[%s1659_s17 + $0x38] sm:$0xf] %vm373_vm0, %v371_v61  ;;  %v372_v9 = vadd.f32 %v356_v33, %v324_v62  ;;  %v461_v15 = vmul.f32 %v1759_v0, %v397_v31  ;;  %v1770_v10 = vrot.slane %v1144_v54, %v1588_v5  ;;  %v1773_v20 = vrot.slane %v1145_v60, %v1582_v2 }
  0x7f   : > { %v524_v24 = vadd.f32 %v508_v63, %v476_v1  ;;  %v509_v25 = vmul.f32 %v1764_v8, %v398_v48  ;;  %v1778_v26 = vrot.slane %v1145_v60, %v1584_v3  ;;  %v1781_v27 = vrot.slane %v1145_v60, %v1586_v4  ;;  %v404_v63 = vld [vmem:[#allocation5 + $0x60] sm:$0xf] }
  0x80   : > { %389 = vst.msk [vmem:[%s1659_s17 + $0x3c] sm:$0xf] %vm373_vm0, %v372_v9  ;;  %v477_v22 = vadd.f32 %v461_v15, %v429_v7  ;;  %v557_v29 = vmul.f32 %v1770_v10, %v399_v56  ;;  %v430_v30 = vmul.f32 %v1773_v20, %v396_v50  ;;  %v1788_v23 = vrot.slane %v1145_v60, %v1588_v5  ;;  %v405_v15 = vld [vmem:[#allocation5 + $0x64] sm:$0xf] }
  0x81   : > { %v572_v38 = vadd.f32 %v556_v6, %v524_v24  ;;  %v462_v28 = vmul.f32 %v1778_v26, %v397_v31  ;;  %v510_v39 = vmul.f32 %v1781_v27, %v398_v48  ;;  %v1793_v11 = vrot.slane %v1146_v21, %v1582_v2 }
  0x82   : > { %v525_v40 = vadd.f32 %v509_v25, %v477_v22  ;;  %v558_v41 = vmul.f32 %v1788_v23, %v399_v56  ;;  %v1797_v44 = vrot.slane %v1146_v21, %v1584_v3  ;;  %v1800_v45 = vrot.slane %v1146_v21, %v1586_v4 }
  0x83   : > { %1147 = vst.msk [vmem:[%s1659_s17 + $0x40] sm:$0xf] %vm373_vm0, %v572_v38  ;;  %v478_v42 = vadd.f32 %v462_v28, %v430_v30  ;;  %v431_v16 = vmul.f32 %v1793_v11, %v396_v50  ;;  %v1806_v17 = vrot.slane %v1146_v21, %v1588_v5  ;;  %v432_v46 = vmul.f32 %v1736_v35, %v400_v34  ;;  %v406_v21 = vld [vmem:[#allocation5 + $0x68] sm:$0xf]  ;;  %v407_v30 = vld [vmem:[#allocation5 + $0x6c] sm:$0xf] }
  0x84   : > { %v573_v18 = vadd.f32 %v557_v29, %v525_v40  ;;  %v463_v19 = vmul.f32 %v1797_v44, %v397_v31  ;;  %v511_v47 = vmul.f32 %v1800_v45, %v398_v48  ;;  %v464_v49 = vmul.f32 %v1739_v36, %v401_v12 }
  0x85   : > { %v526_v43 = vadd.f32 %v510_v39, %v478_v42  ;;  %v559_v54 = vmul.f32 %v1806_v17, %v399_v56  ;;  %v512_v32 = vmul.f32 %v1744_v57, %v402_v13  ;;  %v560_v50 = vmul.f32 %v1749_v58, %v403_v14 }
  0x86   : > { %1148 = vst.msk [vmem:[%s1659_s17 + $0x44] sm:$0xf] %vm373_vm0, %v573_v18  ;;  %v479_v33 = vadd.f32 %v463_v19, %v431_v16  ;;  %v480_v37 = vadd.f32 %v464_v49, %v432_v46  ;;  %v433_v53 = vmul.f32 %v1752_v59, %v400_v34  ;;  %v465_v31 = vmul.f32 %v1759_v0, %v401_v12 }
  0x87   : > { %v574_v55 = vadd.f32 %v558_v41, %v526_v43  ;;  %v513_v48 = vmul.f32 %v1764_v8, %v402_v13  ;;  %v561_v51 = vmul.f32 %v1770_v10, %v403_v14  ;;  %v434_v56 = vmul.f32 %v1773_v20, %v400_v34 }
  0x88   : > { %v527_v52 = vadd.f32 %v511_v47, %v479_v33  ;;  %v528_v60 = vadd.f32 %v512_v32, %v480_v37  ;;  %v481_v61 = vadd.f32 %v465_v31, %v433_v53  ;;  %v466_v62 = vmul.f32 %v1778_v26, %v401_v12  ;;  %v408_v33 = vld [vmem:[#allocation5 + $0x70] sm:$0xf]  ;;  %v409_v37 = vld [vmem:[#allocation5 + $0x74] sm:$0xf] }
  0x89   : > { %1149 = vst.msk [vmem:[%s1659_s17 + $0x48] sm:$0xf] %vm373_vm0, %v574_v55  ;;  %v514_v1 = vmul.f32 %v1781_v27, %v402_v13  ;;  %v562_v6 = vmul.f32 %v1788_v23, %v403_v14  ;;  %v435_v7 = vmul.f32 %v1793_v11, %v400_v34  ;;  %v467_v9 = vmul.f32 %v1797_v44, %v401_v12 }
  0x8a   : > { %v575_v24 = vadd.f32 %v559_v54, %v527_v52  ;;  %v576_v25 = vadd.f32 %v560_v50, %v528_v60  ;;  %v529_v22 = vadd.f32 %v513_v48, %v481_v61  ;;  %v482_v29 = vadd.f32 %v466_v62, %v434_v56  ;;  %v411_v62 = vld [vmem:[#allocation5 + $0x7c] sm:$0xf] }
  0x8b   : > { %v483_v38 = vadd.f32 %v467_v9, %v435_v7  ;;  %v515_v28 = vmul.f32 %v1800_v45, %v402_v13  ;;  %v563_v39 = vmul.f32 %v1806_v17, %v403_v14  ;;  %v436_v40 = vmul.f32 %v1736_v35, %v404_v63 }
  0x8c   : > { %1150 = vst.msk [vmem:[%s1659_s17 + $0x4c] sm:$0xf] %vm373_vm0, %v575_v24  ;;  %1151 = vst.msk [vmem:[%s1659_s17 + $0x50] sm:$0xf] %vm373_vm0, %v576_v25  ;;  %v577_v34 = vadd.f32 %v561_v51, %v529_v22  ;;  %v530_v12 = vadd.f32 %v514_v1, %v482_v29  ;;  %v468_v41 = vmul.f32 %v1739_v36, %v405_v15  ;;  %v410_v51 = vld [vmem:[#allocation5 + $0x78] sm:$0xf] }
  0x8d   : > { %v516_v42 = vmul.f32 %v1744_v57, %v406_v21  ;;  %v531_v16 = vadd.f32 %v515_v28, %v483_v38  ;;  %v564_v46 = vmul.f32 %v1749_v58, %v407_v30  ;;  %v437_v13 = vmul.f32 %v1752_v59, %v404_v63 }
  0x8e   : > { %v469_v14 = vmul.f32 %v1759_v0, %v405_v15  ;;  %1152 = vst.msk [vmem:[%s1659_s17 + $0x54] sm:$0xf] %vm373_vm0, %v577_v34  ;;  %v578_v18 = vadd.f32 %v562_v6, %v530_v12  ;;  %v484_v19 = vadd.f32 %v468_v41, %v436_v40  ;;  %v517_v47 = vmul.f32 %v1764_v8, %v406_v21  ;;  %v1163_v34 = vld [vmem:[%s1572_s3 + $0x20] sm:$0xf] }
  0x8f   : > { %v565_v49 = vmul.f32 %v1770_v10, %v407_v30  ;;  %v579_v43 = vadd.f32 %v563_v39, %v531_v16  ;;  %v438_v32 = vmul.f32 %v1773_v20, %v404_v63  ;;  %v470_v50 = vmul.f32 %v1778_v26, %v405_v15 }
  0x90   : > { %v485_v54 = vadd.f32 %v469_v14, %v437_v13  ;;  %1153 = vst.msk [vmem:[%s1659_s17 + $0x58] sm:$0xf] %vm373_vm0, %v578_v18  ;;  %v532_v53 = vadd.f32 %v516_v42, %v484_v19  ;;  %v518_v31 = vmul.f32 %v1781_v27, %v406_v21  ;;  %v566_v55 = vmul.f32 %v1788_v23, %v407_v30  ;;  %v1164_v13 = vld [vmem:[%s1572_s3 + $0x24] sm:$0xf]  ;;  %v613_v14 = vld [vmem:[#allocation5 + $0x88] sm:$0xf] }
  0x91   : > { %v439_v48 = vmul.f32 %v1793_v11, %v404_v63  ;;  %1154 = vst.msk [vmem:[%s1659_s17 + $0x5c] sm:$0xf] %vm373_vm0, %v579_v43  ;;  %v486_v52 = vadd.f32 %v470_v50, %v438_v32  ;;  %v471_v60 = vmul.f32 %v1797_v44, %v405_v15  ;;  %v519_v61 = vmul.f32 %v1800_v45, %v406_v21  ;;  %v1165_v32 = vld [vmem:[%s1572_s3 + $0x28] sm:$0xf] }
  0x92   : > { %v533_v56 = vadd.f32 %v517_v47, %v485_v54  ;;  %v580_v1 = vadd.f32 %v564_v46, %v532_v53  ;;  %v567_v6 = vmul.f32 %v1806_v17, %v407_v30  ;;  %v440_v7 = vmul.f32 %v1736_v35, %v408_v33  ;;  %v611_v46 = vld [vmem:[#allocation5 + $0x80] sm:$0xf]  ;;  %v614_v47 = vld [vmem:[#allocation5 + $0x8c] sm:$0xf] }
  0x93   : > { %v472_v9 = vmul.f32 %v1739_v36, %v409_v37  ;;  %v534_v24 = vadd.f32 %v518_v31, %v486_v52  ;;  %v487_v25 = vadd.f32 %v471_v60, %v439_v48  ;;  %v520_v22 = vmul.f32 %v1744_v57, %v410_v51 }
  0x94   : > { %v581_v63 = vadd.f32 %v565_v49, %v533_v56  ;;  %1155 = vst.msk [vmem:[%s1659_s17 + $0x60] sm:$0xf] %vm373_vm0, %v580_v1  ;;  %v568_v21 = vmul.f32 %v1749_v58, %v411_v62  ;;  %v441_v29 = vmul.f32 %v1752_v59, %v408_v33  ;;  %v473_v30 = vmul.f32 %v1759_v0, %v409_v37 }
  0x95   : > { %v488_v15 = vadd.f32 %v472_v9, %v440_v7  ;;  %v582_v35 = vadd.f32 %v566_v55, %v534_v24  ;;  %v535_v36 = vadd.f32 %v519_v61, %v487_v25  ;;  %v521_v38 = vmul.f32 %v1764_v8, %v410_v51 }
  0x96   : > { %1156 = vst.msk [vmem:[%s1659_s17 + $0x64] sm:$0xf] %vm373_vm0, %v581_v63  ;;  %v569_v28 = vmul.f32 %v1770_v10, %v411_v62  ;;  %v489_v57 = vadd.f32 %v473_v30, %v441_v29  ;;  %v442_v40 = vmul.f32 %v1773_v20, %v408_v33  ;;  %v474_v58 = vmul.f32 %v1778_v26, %v409_v37  ;;  %v612_v20 = vld [vmem:[#allocation5 + $0x84] sm:$0xf] }
  0x97   : > { %v536_v39 = vadd.f32 %v520_v22, %v488_v15  ;;  %1157 = vst.msk [vmem:[%s1659_s17 + $0x68] sm:$0xf] %vm373_vm0, %v582_v35  ;;  %v583_v59 = vadd.f32 %v567_v6, %v535_v36  ;;  %v522_v0 = vmul.f32 %v1781_v27, %v410_v51  ;;  %v570_v12 = vmul.f32 %v1788_v23, %v411_v62  ;;  %v615_v15 = vld [vmem:[#allocation5 + $0x90] sm:$0xf]  ;;  %v616_v36 = vld [vmem:[#allocation5 + $0x94] sm:$0xf] }
  0x98   : > { %v443_v8 = vmul.f32 %v1793_v11, %v408_v33  ;;  %v537_v41 = vadd.f32 %v521_v38, %v489_v57  ;;  %v490_v42 = vadd.f32 %v474_v58, %v442_v40  ;;  %v475_v16 = vmul.f32 %v1797_v44, %v409_v37  ;;  %v617_v40 = vld [vmem:[#allocation5 + $0x98] sm:$0xf]  ;;  %v618_v58 = vld [vmem:[#allocation5 + $0x9c] sm:$0xf] }
  0x99   : > { %v584_v10 = vadd.f32 %v568_v21, %v536_v39  ;;  %1158 = vst.msk [vmem:[%s1659_s17 + $0x6c] sm:$0xf] %vm373_vm0, %v583_v59  ;;  %v523_v26 = vmul.f32 %v1800_v45, %v410_v51  ;;  %v571_v27 = vmul.f32 %v1806_v17, %v411_v62  ;;  %v1884_v23 = vrot.slane %v1163_v34, %v1582_v2  ;;  %v1166_v62 = vld [vmem:[%s1572_s3 + $0x2c] sm:$0xf] }
  0x9a   : > { %v1887_v11 = vrot.slane %v1163_v34, %v1584_v3  ;;  %v585_v44 = vadd.f32 %v569_v28, %v537_v41  ;;  %v538_v18 = vadd.f32 %v522_v0, %v490_v42  ;;  %v491_v19 = vadd.f32 %v475_v16, %v443_v8 }
  0x9b   : > { %1159 = vst.msk [vmem:[%s1659_s17 + $0x70] sm:$0xf] %vm373_vm0, %v584_v10  ;;  %v1892_v49 = vrot.slane %v1163_v34, %v1586_v4  ;;  %v643_v45 = vmul.f32 %v1884_v23, %v611_v46  ;;  %v1897_v43 = vrot.slane %v1163_v34, %v1588_v5  ;;  %v1900_v54 = vrot.slane %v1164_v13, %v1582_v2 }
  0x9c   : > { %v675_v17 = vmul.f32 %v1887_v11, %v612_v20  ;;  %1160 = vst.msk [vmem:[%s1659_s17 + $0x74] sm:$0xf] %vm373_vm0, %v585_v44  ;;  %v586_v50 = vadd.f32 %v570_v12, %v538_v18  ;;  %v539_v33 = vadd.f32 %v523_v26, %v491_v19  ;;  %v1907_v53 = vrot.slane %v1164_v13, %v1584_v3 }
  0x9d   : > { %v723_v37 = vmul.f32 %v1892_v49, %v613_v14  ;;  %v771_v55 = vmul.f32 %v1897_v43, %v614_v47  ;;  %v644_v48 = vmul.f32 %v1900_v54, %v611_v46  ;;  %v1912_v51 = vrot.slane %v1164_v13, %v1586_v4 }
  0x9e   : > { %v691_v31 = vadd.f32 %v675_v17, %v643_v45  ;;  %1161 = vst.msk [vmem:[%s1659_s17 + $0x78] sm:$0xf] %vm373_vm0, %v586_v50  ;;  %v587_v56 = vadd.f32 %v571_v27, %v539_v33  ;;  %v676_v52 = vmul.f32 %v1907_v53, %v612_v20  ;;  %v1918_v60 = vrot.slane %v1164_v13, %v1588_v5 }
  0x9f   : > { %v1921_v61 = vrot.slane %v1165_v32, %v1582_v2  ;;  %v724_v6 = vmul.f32 %v1912_v51, %v613_v14  ;;  %v1926_v7 = vrot.slane %v1165_v32, %v1584_v3  ;;  %v1929_v9 = vrot.slane %v1165_v32, %v1586_v4 }
  0xa0   : > { %v739_v1 = vadd.f32 %v723_v37, %v691_v31  ;;  %1162 = vst.msk [vmem:[%s1659_s17 + $0x7c] sm:$0xf] %vm373_vm0, %v587_v56  ;;  %v692_v63 = vadd.f32 %v676_v52, %v644_v48  ;;  %v772_v24 = vmul.f32 %v1918_v60, %v614_v47  ;;  %v1936_v22 = vrot.slane %v1165_v32, %v1588_v5  ;;  %v619_v37 = vld [vmem:[#allocation5 + $0xa0] sm:$0xf]  ;;  %v620_v52 = vld [vmem:[#allocation5 + $0xa4] sm:$0xf] }
  0xa1   : > { %v645_v25 = vmul.f32 %v1921_v61, %v611_v46  ;;  %v677_v29 = vmul.f32 %v1926_v7, %v612_v20  ;;  %v725_v30 = vmul.f32 %v1929_v9, %v613_v14  ;;  %v1941_v35 = vrot.slane %v1166_v62, %v1582_v2 }
  0xa2   : > { %v787_v21 = vadd.f32 %v771_v55, %v739_v1  ;;  %v740_v38 = vadd.f32 %v724_v6, %v692_v63  ;;  %v773_v28 = vmul.f32 %v1936_v22, %v614_v47  ;;  %v1945_v39 = vrot.slane %v1166_v62, %v1584_v3 }
  0xa3   : > { %v1948_v57 = vrot.slane %v1166_v62, %v1586_v4  ;;  %v693_v34 = vadd.f32 %v677_v29, %v645_v25  ;;  %v646_v59 = vmul.f32 %v1941_v35, %v611_v46  ;;  %v1954_v0 = vrot.slane %v1166_v62, %v1588_v5  ;;  %v621_v62 = vld [vmem:[#allocation5 + $0xa8] sm:$0xf]  ;;  %v622_v25 = vld [vmem:[#allocation5 + $0xac] sm:$0xf] }
  0xa4   : > { %1167 = vst.msk [vmem:[%s1659_s17 + $0x80] sm:$0xf] %vm373_vm0, %v787_v21  ;;  %v647_v12 = vmul.f32 %v1884_v23, %v615_v15  ;;  %v788_v8 = vadd.f32 %v772_v24, %v740_v38  ;;  %v678_v10 = vmul.f32 %v1945_v39, %v612_v20  ;;  %v679_v42 = vmul.f32 %v1887_v11, %v616_v36 }
  0xa5   : > { %v726_v41 = vmul.f32 %v1948_v57, %v613_v14  ;;  %v741_v16 = vadd.f32 %v725_v30, %v693_v34  ;;  %v774_v13 = vmul.f32 %v1954_v0, %v614_v47  ;;  %v727_v26 = vmul.f32 %v1892_v49, %v617_v40 }
  0xa6   : > { %v775_v46 = vmul.f32 %v1897_v43, %v618_v58  ;;  %1168 = vst.msk [vmem:[%s1659_s17 + $0x84] sm:$0xf] %vm373_vm0, %v788_v8  ;;  %v694_v27 = vadd.f32 %v678_v10, %v646_v59  ;;  %v695_v44 = vadd.f32 %v679_v42, %v647_v12  ;;  %v648_v18 = vmul.f32 %v1900_v54, %v615_v15 }
  0xa7   : > { %v680_v20 = vmul.f32 %v1907_v53, %v616_v36  ;;  %v789_v19 = vadd.f32 %v773_v28, %v741_v16  ;;  %v728_v14 = vmul.f32 %v1912_v51, %v617_v40  ;;  %v776_v45 = vmul.f32 %v1918_v60, %v618_v58 }
  0xa8   : > { %v649_v47 = vmul.f32 %v1921_v61, %v615_v15  ;;  %v742_v17 = vadd.f32 %v726_v41, %v694_v27  ;;  %v743_v32 = vadd.f32 %v727_v26, %v695_v44  ;;  %v681_v33 = vmul.f32 %v1926_v7, %v616_v36  ;;  %v623_v27 = vld [vmem:[#allocation5 + $0xb0] sm:$0xf]  ;;  %v624_v44 = vld [vmem:[#allocation5 + $0xb4] sm:$0xf] }
  0xa9   : > { %v696_v50 = vadd.f32 %v680_v20, %v648_v18  ;;  %1169 = vst.msk [vmem:[%s1659_s17 + $0x88] sm:$0xf] %vm373_vm0, %v789_v19  ;;  %v729_v31 = vmul.f32 %v1929_v9, %v617_v40  ;;  %v777_v55 = vmul.f32 %v1936_v22, %v618_v58  ;;  %v650_v48 = vmul.f32 %v1941_v35, %v615_v15 }
  0xaa   : > { %v682_v56 = vmul.f32 %v1945_v39, %v616_v36  ;;  %v790_v1 = vadd.f32 %v774_v13, %v742_v17  ;;  %v791_v6 = vadd.f32 %v775_v46, %v743_v32  ;;  %v697_v24 = vadd.f32 %v681_v33, %v649_v47  ;;  %v626_v33 = vld [vmem:[#allocation5 + $0xbc] sm:$0xf] }
  0xab   : > { %v744_v63 = vadd.f32 %v728_v14, %v696_v50  ;;  %v730_v29 = vmul.f32 %v1948_v57, %v617_v40  ;;  %v778_v30 = vmul.f32 %v1954_v0, %v618_v58  ;;  %v651_v38 = vmul.f32 %v1884_v23, %v619_v37 }
  0xac   : > { %v698_v21 = vadd.f32 %v682_v56, %v650_v48  ;;  %1170 = vst.msk [vmem:[%s1659_s17 + $0x8c] sm:$0xf] %vm373_vm0, %v790_v1  ;;  %1171 = vst.msk [vmem:[%s1659_s17 + $0x90] sm:$0xf] %vm373_vm0, %v791_v6  ;;  %v745_v36 = vadd.f32 %v729_v31, %v697_v24  ;;  %v683_v28 = vmul.f32 %v1887_v11, %v620_v52 }
  0xad   : > { %v792_v15 = vadd.f32 %v776_v45, %v744_v63  ;;  %v731_v34 = vmul.f32 %v1892_v49, %v621_v62  ;;  %v779_v12 = vmul.f32 %v1897_v43, %v622_v25  ;;  %v652_v40 = vmul.f32 %v1900_v54, %v619_v37  ;;  %v625_v45 = vld [vmem:[#allocation5 + $0xb8] sm:$0xf] }
  0xae   : > { %v746_v59 = vadd.f32 %v730_v29, %v698_v21  ;;  %v684_v58 = vmul.f32 %v1907_v53, %v620_v52  ;;  %v793_v8 = vadd.f32 %v777_v55, %v745_v36  ;;  %v699_v10 = vadd.f32 %v683_v28, %v651_v38 }
  0xaf   : > { %1172 = vst.msk [vmem:[%s1659_s17 + $0x94] sm:$0xf] %vm373_vm0, %v792_v15  ;;  %v732_v41 = vmul.f32 %v1912_v51, %v621_v62  ;;  %v780_v42 = vmul.f32 %v1918_v60, %v622_v25  ;;  %v653_v26 = vmul.f32 %v1921_v61, %v619_v37  ;;  %v685_v46 = vmul.f32 %v1926_v7, %v620_v52  ;;  %v1183_v15 = vld [vmem:[%s1572_s3 + $0x30] sm:$0xf] }
  0xb0   : > { %v794_v16 = vadd.f32 %v778_v30, %v746_v59  ;;  %v700_v13 = vadd.f32 %v684_v58, %v652_v40  ;;  %1173 = vst.msk [vmem:[%s1659_s17 + $0x98] sm:$0xf] %vm373_vm0, %v793_v8  ;;  %v747_v18 = vadd.f32 %v731_v34, %v699_v10  ;;  %v733_v20 = vmul.f32 %v1929_v9, %v621_v62  ;;  %v1184_v40 = vld [vmem:[%s1572_s3 + $0x34] sm:$0xf]  ;;  %v828_v58 = vld [vmem:[#allocation5 + $0xc8] sm:$0xf] }
  0xb1   : > { %v781_v19 = vmul.f32 %v1936_v22, %v622_v25  ;;  %v654_v14 = vmul.f32 %v1941_v35, %v619_v37  ;;  %v701_v17 = vadd.f32 %v685_v46, %v653_v26  ;;  %v686_v32 = vmul.f32 %v1945_v39, %v620_v52  ;;  %v1185_v26 = vld [vmem:[%s1572_s3 + $0x38] sm:$0xf] }
  0xb2   : > { %1174 = vst.msk [vmem:[%s1659_s17 + $0x9c] sm:$0xf] %vm373_vm0, %v794_v16  ;;  %v748_v47 = vadd.f32 %v732_v41, %v700_v13  ;;  %v734_v50 = vmul.f32 %v1948_v57, %v621_v62  ;;  %v795_v31 = vadd.f32 %v779_v12, %v747_v18  ;;  %v782_v55 = vmul.f32 %v1954_v0, %v622_v25  ;;  %v826_v12 = vld [vmem:[#allocation5 + $0xc0] sm:$0xf]  ;;  %v829_v41 = vld [vmem:[#allocation5 + $0xcc] sm:$0xf] }
  0xb3   : > { %v655_v48 = vmul.f32 %v1884_v23, %v623_v27  ;;  %v687_v56 = vmul.f32 %v1887_v11, %v624_v44  ;;  %v749_v1 = vadd.f32 %v733_v20, %v701_v17  ;;  %v702_v6 = vadd.f32 %v686_v32, %v654_v14 }
  0xb4   : > { %v796_v37 = vadd.f32 %v780_v42, %v748_v47  ;;  %v735_v63 = vmul.f32 %v1892_v49, %v625_v45  ;;  %1175 = vst.msk [vmem:[%s1659_s17 + $0xa0] sm:$0xf] %vm373_vm0, %v795_v31  ;;  %v783_v62 = vmul.f32 %v1897_v43, %v626_v33  ;;  %v656_v24 = vmul.f32 %v1900_v54, %v623_v27 }
  0xb5   : > { %v703_v52 = vadd.f32 %v687_v56, %v655_v48  ;;  %v688_v25 = vmul.f32 %v1907_v53, %v624_v44  ;;  %v797_v23 = vadd.f32 %v781_v19, %v749_v1  ;;  %v750_v11 = vadd.f32 %v734_v50, %v702_v6 }
  0xb6   : > { %1176 = vst.msk [vmem:[%s1659_s17 + $0xa4] sm:$0xf] %vm373_vm0, %v796_v37  ;;  %v736_v21 = vmul.f32 %v1912_v51, %v625_v45  ;;  %v784_v29 = vmul.f32 %v1918_v60, %v626_v33  ;;  %v657_v38 = vmul.f32 %v1921_v61, %v623_v27  ;;  %v689_v43 = vmul.f32 %v1926_v7, %v624_v44  ;;  %v827_v61 = vld [vmem:[#allocation5 + $0xc4] sm:$0xf] }
  0xb7   : > { %v751_v30 = vadd.f32 %v735_v63, %v703_v52  ;;  %v704_v49 = vadd.f32 %v688_v25, %v656_v24  ;;  %1177 = vst.msk [vmem:[%s1659_s17 + $0xa8] sm:$0xf] %vm373_vm0, %v797_v23  ;;  %v798_v54 = vadd.f32 %v782_v55, %v750_v11  ;;  %v737_v53 = vmul.f32 %v1929_v9, %v625_v45  ;;  %v830_v52 = vld [vmem:[#allocation5 + $0xd0] sm:$0xf]  ;;  %v831_v11 = vld [vmem:[#allocation5 + $0xd4] sm:$0xf] }
  0xb8   : > { %v785_v36 = vmul.f32 %v1936_v22, %v626_v33  ;;  %v658_v51 = vmul.f32 %v1941_v35, %v623_v27  ;;  %v705_v34 = vadd.f32 %v689_v43, %v657_v38  ;;  %v690_v59 = vmul.f32 %v1945_v39, %v624_v44  ;;  %v832_v38 = vld [vmem:[#allocation5 + $0xd8] sm:$0xf]  ;;  %v833_v43 = vld [vmem:[#allocation5 + $0xdc] sm:$0xf] }
  0xb9   : > { %v799_v60 = vadd.f32 %v783_v62, %v751_v30  ;;  %v752_v28 = vadd.f32 %v736_v21, %v704_v49  ;;  %1178 = vst.msk [vmem:[%s1659_s17 + $0xac] sm:$0xf] %vm373_vm0, %v798_v54  ;;  %v738_v7 = vmul.f32 %v1948_v57, %v625_v45  ;;  %v786_v9 = vmul.f32 %v1954_v0, %v626_v33  ;;  %v1186_v33 = vld [vmem:[%s1572_s3 + $0x3c] sm:$0xf] }
  0xba   : > { %v2032_v22 = vrot.slane %v1183_v15, %v1582_v2  ;;  %v2035_v35 = vrot.slane %v1183_v15, %v1584_v3  ;;  %v753_v8 = vadd.f32 %v737_v53, %v705_v34  ;;  %v706_v10 = vadd.f32 %v690_v59, %v658_v51 }
  0xbb   : > { %1179 = vst.msk [vmem:[%s1659_s17 + $0xb0] sm:$0xf] %vm373_vm0, %v799_v60  ;;  %v800_v39 = vadd.f32 %v784_v29, %v752_v28  ;;  %v2040_v42 = vrot.slane %v1183_v15, %v1586_v4  ;;  %v2045_v16 = vrot.slane %v1183_v15, %v1588_v5  ;;  %v2048_v13 = vrot.slane %v1184_v40, %v1582_v2 }
  0xbc   : > { %v858_v57 = vmul.f32 %v2032_v22, %v826_v12  ;;  %v890_v0 = vmul.f32 %v2035_v35, %v827_v61  ;;  %v801_v46 = vadd.f32 %v785_v36, %v753_v8  ;;  %v754_v27 = vadd.f32 %v738_v7, %v706_v10 }
  0xbd   : > { %1180 = vst.msk [vmem:[%s1659_s17 + $0xb4] sm:$0xf] %vm373_vm0, %v800_v39  ;;  %v938_v44 = vmul.f32 %v2040_v42, %v828_v58  ;;  %v2055_v18 = vrot.slane %v1184_v40, %v1584_v3  ;;  %v986_v19 = vmul.f32 %v2045_v16, %v829_v41  ;;  %v859_v14 = vmul.f32 %v2048_v13, %v826_v12 }
  0xbe   : > { %v906_v20 = vadd.f32 %v890_v0, %v858_v57  ;;  %v2060_v45 = vrot.slane %v1184_v40, %v1586_v4  ;;  %1181 = vst.msk [vmem:[%s1659_s17 + $0xb8] sm:$0xf] %vm373_vm0, %v801_v46  ;;  %v802_v47 = vadd.f32 %v786_v9, %v754_v27  ;;  %v2066_v32 = vrot.slane %v1184_v40, %v1588_v5  ;;  %v834_v0 = vld [vmem:[#allocation5 + $0xe0] sm:$0xf] }
  0xbf   : > { %v891_v17 = vmul.f32 %v2055_v18, %v827_v61  ;;  %v2069_v50 = vrot.slane %v1185_v26, %v1582_v2  ;;  %v2074_v48 = vrot.slane %v1185_v26, %v1584_v3  ;;  %v2077_v56 = vrot.slane %v1185_v26, %v1586_v4 }
  0xc0   : > { %v954_v31 = vadd.f32 %v938_v44, %v906_v20  ;;  %v939_v55 = vmul.f32 %v2060_v45, %v828_v58  ;;  %1182 = vst.msk [vmem:[%s1659_s17 + $0xbc] sm:$0xf] %vm373_vm0, %v802_v47  ;;  %v987_v1 = vmul.f32 %v2066_v32, %v829_v41  ;;  %v2084_v63 = vrot.slane %v1185_v26, %v1588_v5  ;;  %v835_v20 = vld [vmem:[#allocation5 + $0xe4] sm:$0xf] }
  0xc1   : > { %v907_v37 = vadd.f32 %v891_v17, %v859_v14  ;;  %v860_v6 = vmul.f32 %v2069_v50, %v826_v12  ;;  %v892_v24 = vmul.f32 %v2074_v48, %v827_v61  ;;  %v940_v25 = vmul.f32 %v2077_v56, %v828_v58 }
  0xc2   : > { %v1002_v62 = vadd.f32 %v986_v19, %v954_v31  ;;  %v2089_v23 = vrot.slane %v1186_v33, %v1582_v2  ;;  %v988_v29 = vmul.f32 %v2084_v63, %v829_v41  ;;  %v2093_v30 = vrot.slane %v1186_v33, %v1584_v3  ;;  %v836_v19 = vld [vmem:[#allocation5 + $0xe8] sm:$0xf]  ;;  %v837_v31 = vld [vmem:[#allocation5 + $0xec] sm:$0xf] }
  0xc3   : > { %v955_v21 = vadd.f32 %v939_v55, %v907_v37  ;;  %v2096_v49 = vrot.slane %v1186_v33, %v1586_v4  ;;  %v908_v15 = vadd.f32 %v892_v24, %v860_v6  ;;  %v2102_v2 = vrot.slane %v1186_v33, %v1588_v5 }
  0xc4   : > { %1187 = vst.msk [vmem:[%s1659_s17 + $0xc0] sm:$0xf] %vm373_vm0, %v1002_v62  ;;  %v861_v54 = vmul.f32 %v2089_v23, %v826_v12  ;;  %v862_v53 = vmul.f32 %v2032_v22, %v830_v52  ;;  %v893_v3 = vmul.f32 %v2093_v30, %v827_v61  ;;  %v894_v4 = vmul.f32 %v2035_v35, %v831_v11 }
  0xc5   : > { %v1003_v36 = vadd.f32 %v987_v1, %v955_v21  ;;  %v941_v51 = vmul.f32 %v2096_v49, %v828_v58  ;;  %v956_v60 = vadd.f32 %v940_v25, %v908_v15  ;;  %v989_v28 = vmul.f32 %v2102_v2, %v829_v41 }
  0xc6   : > { %v942_v34 = vmul.f32 %v2040_v42, %v832_v38  ;;  %v990_v59 = vmul.f32 %v2045_v16, %v833_v43  ;;  %v909_v5 = vadd.f32 %v893_v3, %v861_v54  ;;  %v910_v12 = vadd.f32 %v894_v4, %v862_v53 }
  0xc7   : > { %1188 = vst.msk [vmem:[%s1659_s17 + $0xc4] sm:$0xf] %vm373_vm0, %v1003_v36  ;;  %v863_v40 = vmul.f32 %v2048_v13, %v830_v52  ;;  %v895_v61 = vmul.f32 %v2055_v18, %v831_v11  ;;  %v1004_v7 = vadd.f32 %v988_v29, %v956_v60  ;;  %v943_v9 = vmul.f32 %v2060_v45, %v832_v38  ;;  %v838_v60 = vld [vmem:[#allocation5 + $0xf0] sm:$0xf] }
  0xc8   : > { %v991_v58 = vmul.f32 %v2066_v32, %v833_v43  ;;  %v864_v39 = vmul.f32 %v2069_v50, %v830_v52  ;;  %v957_v8 = vadd.f32 %v941_v51, %v909_v5  ;;  %v958_v10 = vadd.f32 %v942_v34, %v910_v12 }
  0xc9   : > { %v911_v41 = vadd.f32 %v895_v61, %v863_v40  ;;  %v896_v57 = vmul.f32 %v2074_v48, %v831_v11  ;;  %1189 = vst.msk [vmem:[%s1659_s17 + $0xc8] sm:$0xf] %vm373_vm0, %v1004_v7  ;;  %v944_v26 = vmul.f32 %v2077_v56, %v832_v38  ;;  %v992_v46 = vmul.f32 %v2084_v63, %v833_v43  ;;  %v840_v40 = vld [vmem:[#allocation5 + $0xf8] sm:$0xf] }
  0xca   : > { %v865_v27 = vmul.f32 %v2089_v23, %v830_v52  ;;  %v897_v44 = vmul.f32 %v2093_v30, %v831_v11  ;;  %v1005_v14 = vadd.f32 %v989_v28, %v957_v8  ;;  %v1006_v47 = vadd.f32 %v990_v59, %v958_v10  ;;  %v839_v28 = vld [vmem:[#allocation5 + $0xf4] sm:$0xf] }
  0xcb   : > { %v959_v17 = vadd.f32 %v943_v9, %v911_v41  ;;  %v912_v33 = vadd.f32 %v896_v57, %v864_v39  ;;  %v945_v37 = vmul.f32 %v2096_v49, %v832_v38  ;;  %v993_v1 = vmul.f32 %v2102_v2, %v833_v43  ;;  %v841_v39 = vld [vmem:[#allocation5 + $0xfc] sm:$0xf] }
  0xcc   : > { %v913_v55 = vadd.f32 %v897_v44, %v865_v27  ;;  %v866_v6 = vmul.f32 %v2032_v22, %v834_v0  ;;  %1190 = vst.msk [vmem:[%s1659_s17 + $0xcc] sm:$0xf] %vm373_vm0, %v1005_v14  ;;  %1191 = vst.msk [vmem:[%s1659_s17 + $0xd0] sm:$0xf] %vm373_vm0, %v1006_v47  ;;  %v898_v24 = vmul.f32 %v2035_v35, %v835_v20 }
  0xcd   : > { %v1007_v52 = vadd.f32 %v991_v58, %v959_v17  ;;  %v960_v62 = vadd.f32 %v944_v26, %v912_v33  ;;  %v946_v25 = vmul.f32 %v2040_v42, %v836_v19  ;;  %v994_v21 = vmul.f32 %v2045_v16, %v837_v31 }
  0xce   : > { %v961_v11 = vadd.f32 %v945_v37, %v913_v55  ;;  %v867_v29 = vmul.f32 %v2048_v13, %v834_v0  ;;  %v899_v38 = vmul.f32 %v2055_v18, %v835_v20  ;;  %v914_v15 = vadd.f32 %v898_v24, %v866_v6 }
  0xcf   : > { %1192 = vst.msk [vmem:[%s1659_s17 + $0xd4] sm:$0xf] %vm373_vm0, %v1007_v52  ;;  %v1008_v43 = vadd.f32 %v992_v46, %v960_v62  ;;  %v947_v54 = vmul.f32 %v2060_v45, %v836_v19  ;;  %v995_v53 = vmul.f32 %v2066_v32, %v837_v31  ;;  %v868_v51 = vmul.f32 %v2069_v50, %v834_v0 }
  0xd0   : > { %v1009_v36 = vadd.f32 %v993_v1, %v961_v11  ;;  %v915_v3 = vadd.f32 %v899_v38, %v867_v29  ;;  %v900_v4 = vmul.f32 %v2074_v48, %v835_v20  ;;  %v962_v34 = vadd.f32 %v946_v25, %v914_v15 }
  0xd1   : > { %1193 = vst.msk [vmem:[%s1659_s17 + $0xd8] sm:$0xf] %vm373_vm0, %v1008_v43  ;;  %v948_v59 = vmul.f32 %v2077_v56, %v836_v19  ;;  %v996_v5 = vmul.f32 %v2084_v63, %v837_v31  ;;  %v869_v12 = vmul.f32 %v2089_v23, %v834_v0  ;;  %v901_v9 = vmul.f32 %v2093_v30, %v835_v20 }
  0xd2   : > { %1194 = vst.msk [vmem:[%s1659_s17 + $0xdc] sm:$0xf] %vm373_vm0, %v1009_v36  ;;  %v963_v61 = vadd.f32 %v947_v54, %v915_v3  ;;  %v916_v7 = vadd.f32 %v900_v4, %v868_v51  ;;  %v949_v58 = vmul.f32 %v2096_v49, %v836_v19  ;;  %v1010_v8 = vadd.f32 %v994_v21, %v962_v34 }
  0xd3   : > { %v997_v10 = vmul.f32 %v2102_v2, %v837_v31  ;;  %v870_v41 = vmul.f32 %v2032_v22, %v838_v60  ;;  %v902_v57 = vmul.f32 %v2035_v35, %v839_v28  ;;  %v917_v46 = vadd.f32 %v901_v9, %v869_v12 }
  0xd4   : > { %v1011_v0 = vadd.f32 %v995_v53, %v963_v61  ;;  %v964_v26 = vadd.f32 %v948_v59, %v916_v7  ;;  %v950_v27 = vmul.f32 %v2040_v42, %v840_v40  ;;  %1195 = vst.msk [vmem:[%s1659_s17 + $0xe0] sm:$0xf] %vm373_vm0, %v1010_v8  ;;  %v998_v20 = vmul.f32 %v2045_v16, %v841_v39 }
  0xd5   : > { %v918_v44 = vadd.f32 %v902_v57, %v870_v41  ;;  %v871_v19 = vmul.f32 %v2048_v13, %v838_v60  ;;  %v903_v14 = vmul.f32 %v2055_v18, %v839_v28  ;;  %v965_v47 = vadd.f32 %v949_v58, %v917_v46 }
  0xd6   : > { %1196 = vst.msk [vmem:[%s1659_s17 + $0xe4] sm:$0xf] %vm373_vm0, %v1011_v0  ;;  %v1012_v22 = vadd.f32 %v996_v5, %v964_v26  ;;  %v951_v35 = vmul.f32 %v2060_v45, %v840_v40  ;;  %v999_v17 = vmul.f32 %v2066_v32, %v841_v39  ;;  %v872_v31 = vmul.f32 %v2069_v50, %v838_v60 }
  0xd7   : > { %v966_v42 = vadd.f32 %v950_v27, %v918_v44  ;;  %v919_v33 = vadd.f32 %v903_v14, %v871_v19  ;;  %v904_v16 = vmul.f32 %v2074_v48, %v839_v28  ;;  %v1013_v13 = vadd.f32 %v997_v10, %v965_v47 }
  0xd8   : > { %1197 = vst.msk [vmem:[%s1659_s17 + $0xe8] sm:$0xf] %vm373_vm0, %v1012_v22  ;;  %v952_v18 = vmul.f32 %v2077_v56, %v840_v40  ;;  %v1000_v55 = vmul.f32 %v2084_v63, %v841_v39  ;;  %v873_v45 = vmul.f32 %v2089_v23, %v838_v60  ;;  %v905_v50 = vmul.f32 %v2093_v30, %v839_v28 }
  0xd9   : > { %v1014_v32 = vadd.f32 %v998_v20, %v966_v42  ;;  %v967_v37 = vadd.f32 %v951_v35, %v919_v33  ;;  %v920_v1 = vadd.f32 %v904_v16, %v872_v31  ;;  %1198 = vst.msk [vmem:[%s1659_s17 + $0xec] sm:$0xf] %vm373_vm0, %v1013_v13  ;;  %v953_v48 = vmul.f32 %v2096_v49, %v840_v40 }
  0xda   : > { %v921_v63 = vadd.f32 %v905_v50, %v873_v45  ;;  %v1001_v23 = vmul.f32 %v2102_v2, %v841_v39 }
  0xdb   : > { %1199 = vst.msk [vmem:[%s1659_s17 + $0xf0] sm:$0xf] %vm373_vm0, %v1014_v32  ;;  %v1015_v56 = vadd.f32 %v999_v17, %v967_v37  ;;  %v968_v6 = vadd.f32 %v952_v18, %v920_v1 }
  0xdc   : > { %v969_v30 = vadd.f32 %v953_v48, %v921_v63 }
  0xdd   : > { %1200 = vst.msk [vmem:[%s1659_s17 + $0xf4] sm:$0xf] %vm373_vm0, %v1015_v56  ;;  %v1016_v52 = vadd.f32 %v1000_v55, %v968_v6 }
  0xde   : > { %v1017_v49 = vadd.f32 %v1001_v23, %v969_v30 }
  0xdf   : > { %1201 = vst.msk [vmem:[%s1659_s17 + $0xf8] sm:$0xf] %vm373_vm0, %v1016_v52 }
  0xe0   : > { %1202 = vst.msk [vmem:[%s1659_s17 + $0xfc] sm:$0xf] %vm373_vm0, %v1017_v49 }
  0xe1   : > { %1342 = shalt.err (!%p1339_p7)
}
  0xe2   : > { %s1343_s18 = scalar_lea.hbm %s2186_s23, 4096  ;;  %s1347_s26 = scalar_lea.hbm %s2238_s2, 8192 }
  0xe3   : > { %p1344_p9 = scmp.ne.s32.totalorder %s2186_s23, %s1343_s18  ;;  %p1348_p5 = scmp.lt.u32.totalorder %s2186_s23, %s2238_s2 }
  0xe4   : > { %p1349_p11 = scmp.lt.u32.totalorder %s1347_s26, %s1343_s18  ;;  %p1351_p4 = scmp.lt.u32.totalorder %s1343_s18, %s2186_s23 }
  0xe5   : > { %p1345_p1 = pnand %p1344_p9, %p1517_p12 }
  0xe6   : > { %p1350_p2 = por %p1349_p11, %p1348_p5 }
  0xe7   : > { %p1346_p0 = pneg %p1345_p1 }
  0xe8   : > { %p1352_p6 = por %p1351_p4, %p1350_p2 }
  0xea   : > { %p1353_p8 = pnand %p1352_p6, %p1346_p0 }
  0xec   : > { %1356 = shalt.err (!%p1353_p8)
}
  0xed   : > { %s1406_s3 = smov 64   ;;  %s1407_s15 = smov 4  }
  0xee   : > { %1216 = dma.vmem_to_hbm [thread:$0]  (%p1517_p12), %s2188_s5, 4096, %s2186_s23, %s1036_s13, %s1406_s3, %s1406_s3, %s1407_s15  }
  0xef PF: > { %s1064_s17 = sand.u32 1, %s1387_s9   ;;  %p2253_p10 = scmp.ne.s32.totalorder %s2243_s16, 0 }
  0xf0   : > { %p2254_p13 = scmp.ge.s32.totalorder %s1399_s12, 2  ;;  %s1065_s4 = scalar_lea.sflag [#allocation4], %s1064_s17 }
  0xf2   : > { %p1227_p3 = pnand %p2254_p13, %p2253_p10 }
  0xf4   : > { %1382 = dma.done.wait (!%p1227_p3), %s1065_s4, 4096  }
  0xf5   : > { %1384 = vsyncadd (!%p1227_p3), %s1065_s4, 4294963200  ;;  %p16_p7 = scmp.ge.s32.totalorder %s1479_s21, 4   ;;  %s2255_s9 = smov %s1391_s10 }
  0xf6   : > { %s2256_s10 = smov %s1395_s11  ;;  %s2257_s11 = smov %s1513_s8 }
  0xf7   : > { %s2258_s12 = smov %s1479_s21  ;;  %18 = sbr.rel (!%p16_p7) target bundleno = 6 (0x6), region = 86 }
  0xfe   :  { %1070 = vsyncpa [#allocation3], 1 }
  0xff   :  { %1072 = vsyncpa [#allocation3 + $0x1], 1 }
 0x100   :  { %1073 = vsyncpa [#allocation6], 1 }
 0x101   :  { %1074 = vsyncpa [#allocation4], 1 }
 0x102   :  { %1076 = vsyncpa [#allocation4 + $0x1], 1 }

</bundles_post_ra>
